<compile_context>
chip_gen: v5e
topology: v5e:2x2
jax: 0.10.0
libtpu: 0.0.40
codegen_flags: <defaults>
</compile_context>

<pallas_src>
import jax
import jax.numpy as jnp
from jax.experimental import pallas as pl
from jax.experimental.pallas import tpu as pltpu

IN_DIM = 8 * 8       # 64
H1_DIM = 256
H2_DIM = 512
OUT_DIM = 64 * 64    # 4096
TN = 1024            # fc3 output tile (multiple of 256 MXU width); 4096/TN tiles
TB_MAX = 256         # max batch rows per tile


def kan_sr_kernel(x_ref, w1_ref, b1_ref, w2_ref, b2_ref, w3_ref, b3_ref, o_ref):
    """One (batch tile, fc3 output tile): relu(fc1) -> relu(fc2) -> sigmoid(fc3[:, tile])."""
    x = x_ref[...]                                               # (TB, 64)

    h1 = jnp.dot(x, w1_ref[...], preferred_element_type=jnp.float32)
    h1 = jnp.maximum(h1 + b1_ref[...], 0.0)                      # (TB, 256)

    h2 = jnp.dot(h1, w2_ref[...], preferred_element_type=jnp.float32)
    h2 = jnp.maximum(h2 + b2_ref[...], 0.0)                      # (TB, 512)

    h3 = jnp.dot(h2, w3_ref[...], preferred_element_type=jnp.float32)
    h3 = h3 + b3_ref[...]                                        # (TB, TN)

    o_ref[...] = jax.nn.sigmoid(h3).astype(o_ref.dtype)


@jax.jit
def kan_sr_forward(x_nchw, w1, b1, w2, b2, w3, b3):
    """x_nchw: (B, 1, 8, 8) float32 -> (B, 1, 64, 64) float32."""
    B = x_nchw.shape[0]
    x = x_nchw.reshape(B, IN_DIM)                  # same as torch .view(-1, 64)

    # Pad batch to a multiple of 8 sublanes; if it exceeds TB_MAX, round up to a
    # multiple of TB_MAX so the batch-tile grid divides evenly. Padded rows are
    # sliced off at the end (perf-only padding).
    b_pad = max(8, -(-B // 8) * 8)
    if b_pad > TB_MAX:
        b_pad = -(-b_pad // TB_MAX) * TB_MAX
        tb = TB_MAX
    else:
        tb = b_pad
    if b_pad != B:
        x = jnp.pad(x, ((0, b_pad - B), (0, 0)))

    # Biases kept 2D (1, N) so they broadcast over rows inside the kernel.
    b1_2d = b1.reshape(1, H1_DIM)
    b2_2d = b2.reshape(1, H2_DIM)
    b3_2d = b3.reshape(1, OUT_DIM)

    # Blocks whose index never changes across the grid (fetched once, resident).
    const = lambda shape: pl.BlockSpec(shape, lambda j, i: tuple(0 for _ in shape))

    n_tiles = OUT_DIM // TN
    b_tiles = b_pad // tb

    # Actual work (fc1/fc2 recomputed once per w3 tile).
    flops = 2 * b_pad * (
        n_tiles * (IN_DIM * H1_DIM + H1_DIM * H2_DIM) + H2_DIM * OUT_DIM
    )
    bytes_accessed = 4 * (
        b_pad * IN_DIM
        + IN_DIM * H1_DIM + H1_DIM
        + H1_DIM * H2_DIM + H2_DIM
        + H2_DIM * OUT_DIM + OUT_DIM
        + b_pad * OUT_DIM
    )

    out = pl.pallas_call(
        kan_sr_kernel,
        out_shape=jax.ShapeDtypeStruct((b_pad, OUT_DIM), jnp.float32),
        grid_spec=pltpu.PrefetchScalarGridSpec(
            num_scalar_prefetch=0,
            # j (w3 tile) is the OUTER axis so each w3 tile is fetched once and
            # stays resident across the inner batch-tile axis.
            grid=(n_tiles, b_tiles),
            in_specs=[
                pl.BlockSpec((tb, IN_DIM), lambda j, i: (i, 0)),   # x   (per batch tile)
                const((IN_DIM, H1_DIM)),                           # w1  (resident)
                const((1, H1_DIM)),                                # b1  (resident)
                const((H1_DIM, H2_DIM)),                           # w2  (resident)
                const((1, H2_DIM)),                                # b2  (resident)
                pl.BlockSpec((H2_DIM, TN), lambda j, i: (0, j)),   # w3  (streamed over j)
                pl.BlockSpec((1, TN), lambda j, i: (0, j)),        # b3  tile
            ],
            out_specs=pl.BlockSpec((tb, TN), lambda j, i: (i, j)),
        ),
        compiler_params=pltpu.CompilerParams(
            # Independent output tiles on both axes -> megacore-shardable on
            # v7x; harmless on single-TC v5e/v6e.
            dimension_semantics=("parallel", "parallel"),
        ),
        cost_estimate=pl.CostEstimate(
            flops=flops,
            transcendentals=b_pad * OUT_DIM,       # sigmoid (exp + recip)
            bytes_accessed=bytes_accessed,
        ),
    )(x, w1, b1_2d, w2, b2_2d, w3, b3_2d)

    return out[:B].reshape(B, 1, 64, 64)


def init_params(key):
    """Deterministic param init matching nn.Linear shapes (stored as (in, out))."""
    ks = jax.random.split(key, 6)

    def linear(k_w, k_b, fan_in, fan_out):
        # PyTorch default Linear init: U(-1/sqrt(fan_in), 1/sqrt(fan_in))
        bound = 1.0 / jnp.sqrt(jnp.float32(fan_in))
        w = jax.random.uniform(k_w, (fan_in, fan_out), jnp.float32, -bound, bound)
        b = jax.random.uniform(k_b, (fan_out,), jnp.float32, -bound, bound)
        return w, b

    w1, b1 = linear(ks[0], ks[1], IN_DIM, H1_DIM)
    w2, b2 = linear(ks[2], ks[3], H1_DIM, H2_DIM)
    w3, b3 = linear(ks[4], ks[5], H2_DIM, OUT_DIM)
    return w1, b1, w2, b2, w3, b3


def reference_forward(x_nchw, w1, b1, w2, b2, w3, b3):
    """Pure-JAX reference mirroring the PyTorch module."""
    B = x_nchw.shape[0]
    x = x_nchw.reshape(B, IN_DIM)
    h1 = jnp.maximum(x @ w1 + b1, 0.0)
    h2 = jnp.maximum(h1 @ w2 + b2, 0.0)
    y = jax.nn.sigmoid(h2 @ w3 + b3)
    return y.reshape(B, 1, 64, 64)


if __name__ == "__main__":
    key = jax.random.PRNGKey(0)
    k_params, k_x = jax.random.split(key)

    params = init_params(k_params)

    B = 2
    x = jax.random.normal(k_x, (B, 1, 8, 8), jnp.float32)   # NCHW input

    out = kan_sr_forward(x, *params)
    out = jax.block_until_ready(out)

    ref = reference_forward(x, *params)
    assert out.shape == (B, 1, 64, 64), out.shape
    assert jnp.allclose(out, ref, atol=1e-5, rtol=1e-5), float(jnp.max(jnp.abs(out - ref)))

    print("KERNEL_OK")
</pallas_src>

<mosaic_0001>
module attributes {stable_mosaic.version = 11 : i64} {
  func.func @kan_sr_kernel(%arg0: i32, %arg1: i32, %arg2: memref<8x64xf32, #tpu.memory_space<vmem>>, %arg3: memref<64x256xf32, #tpu.memory_space<vmem>>, %arg4: memref<1x256xf32, #tpu.memory_space<vmem>>, %arg5: memref<256x512xf32, #tpu.memory_space<vmem>>, %arg6: memref<1x512xf32, #tpu.memory_space<vmem>>, %arg7: memref<512x1024xf32, #tpu.memory_space<vmem>>, %arg8: memref<1x1024xf32, #tpu.memory_space<vmem>>, %arg9: memref<8x1024xf32, #tpu.memory_space<vmem>>) attributes {dimension_semantics = [#tpu.dimension_semantics<parallel>, #tpu.dimension_semantics<parallel>], iteration_bounds = array<i64: 4, 1>, scalar_prefetch = 0 : i64, scratch_operands = 0 : i64, tpu.core_type = #tpu.core_type<tc>, window_params = [{transform_indices = @transform_0, window_bounds = array<i64: 8, 64>}, {pipeline_mode = #tpu.pipeline_mode<synchronous>, transform_indices = @transform_1, window_bounds = array<i64: 64, 256>}, {pipeline_mode = #tpu.pipeline_mode<synchronous>, transform_indices = @transform_2, window_bounds = array<i64: 1, 256>}, {pipeline_mode = #tpu.pipeline_mode<synchronous>, transform_indices = @transform_3, window_bounds = array<i64: 256, 512>}, {pipeline_mode = #tpu.pipeline_mode<synchronous>, transform_indices = @transform_4, window_bounds = array<i64: 1, 512>}, {transform_indices = @transform_5, window_bounds = array<i64: 512, 1024>}, {transform_indices = @transform_6, window_bounds = array<i64: 1, 1024>}, {transform_indices = @transform_7, window_bounds = array<i64: 8, 1024>}]} {
    %c0 = arith.constant 0 : index
    %c0_0 = arith.constant 0 : index
    %0 = vector.load %arg2[%c0, %c0_0] : memref<8x64xf32, #tpu.memory_space<vmem>>, vector<8x64xf32>
    %c0_1 = arith.constant 0 : index
    %c0_2 = arith.constant 0 : index
    %1 = vector.load %arg3[%c0_1, %c0_2] : memref<64x256xf32, #tpu.memory_space<vmem>>, vector<64x256xf32>
    %cst = arith.constant dense<0.000000e+00> : vector<8x256xf32>
    %2 = tpu.matmul %0, %1, %cst {dimension_numbers = #tpu.dot_dimension_numbers<[1], [0], [0], [1], [0, 0, 1, 1], [], []>} : vector<8x64xf32>, vector<64x256xf32>, vector<8x256xf32> -> vector<8x256xf32>
    %c0_3 = arith.constant 0 : index
    %c0_4 = arith.constant 0 : index
    %3 = vector.load %arg4[%c0_3, %c0_4] : memref<1x256xf32, #tpu.memory_space<vmem>>, vector<1x256xf32>
    %4 = vector.broadcast %3 : vector<1x256xf32> to vector<8x256xf32>
    %5 = arith.addf %2, %4 : vector<8x256xf32>
    %cst_5 = arith.constant 0.000000e+00 : f32
    %6 = vector.broadcast %cst_5 : f32 to vector<8x256xf32>
    %7 = arith.maximumf %5, %6 : vector<8x256xf32>
    %c0_6 = arith.constant 0 : index
    %c0_7 = arith.constant 0 : index
    %8 = vector.load %arg5[%c0_6, %c0_7] : memref<256x512xf32, #tpu.memory_space<vmem>>, vector<256x512xf32>
    %cst_8 = arith.constant dense<0.000000e+00> : vector<8x512xf32>
    %9 = tpu.matmul %7, %8, %cst_8 {dimension_numbers = #tpu.dot_dimension_numbers<[1], [0], [0], [1], [0, 0, 1, 1], [], []>} : vector<8x256xf32>, vector<256x512xf32>, vector<8x512xf32> -> vector<8x512xf32>
    %c0_9 = arith.constant 0 : index
    %c0_10 = arith.constant 0 : index
    %10 = vector.load %arg6[%c0_9, %c0_10] : memref<1x512xf32, #tpu.memory_space<vmem>>, vector<1x512xf32>
    %11 = vector.broadcast %10 : vector<1x512xf32> to vector<8x512xf32>
    %12 = arith.addf %9, %11 : vector<8x512xf32>
    %cst_11 = arith.constant 0.000000e+00 : f32
    %13 = vector.broadcast %cst_11 : f32 to vector<8x512xf32>
    %14 = arith.maximumf %12, %13 : vector<8x512xf32>
    %c0_12 = arith.constant 0 : index
    %c0_13 = arith.constant 0 : index
    %15 = vector.load %arg7[%c0_12, %c0_13] : memref<512x1024xf32, #tpu.memory_space<vmem>>, vector<512x1024xf32>
    %cst_14 = arith.constant dense<0.000000e+00> : vector<8x1024xf32>
    %16 = tpu.matmul %14, %15, %cst_14 {dimension_numbers = #tpu.dot_dimension_numbers<[1], [0], [0], [1], [0, 0, 1, 1], [], []>} : vector<8x512xf32>, vector<512x1024xf32>, vector<8x1024xf32> -> vector<8x1024xf32>
    %c0_15 = arith.constant 0 : index
    %c0_16 = arith.constant 0 : index
    %17 = vector.load %arg8[%c0_15, %c0_16] : memref<1x1024xf32, #tpu.memory_space<vmem>>, vector<1x1024xf32>
    %18 = vector.broadcast %17 : vector<1x1024xf32> to vector<8x1024xf32>
    %19 = arith.addf %16, %18 : vector<8x1024xf32>
    %20 = arith.negf %19 : vector<8x1024xf32>
    %21 = math.exp %20 : vector<8x1024xf32>
    %cst_17 = arith.constant 1.000000e+00 : f32
    %22 = vector.broadcast %cst_17 : f32 to vector<8x1024xf32>
    %23 = arith.addf %22, %21 : vector<8x1024xf32>
    %24 = arith.divf %22, %23 : vector<8x1024xf32>
    %c0_18 = arith.constant 0 : index
    %c0_19 = arith.constant 0 : index
    %25 = vector.load %arg9[%c0_18, %c0_19] : memref<8x1024xf32, #tpu.memory_space<vmem>>, vector<8x1024xf32>
    tpu.vector_store %arg9[%c0_18, %c0_19], %24 {strides = array<i32>} : memref<8x1024xf32, #tpu.memory_space<vmem>>, vector<8x1024xf32>,
    return
  }
  func.func @transform_0(%arg0: i32, %arg1: i32) -> (i32, i32) {
    %c0_i32 = arith.constant 0 : i32
    %c0_i32_0 = arith.constant 0 : i32
    return %arg1, %c0_i32 : i32, i32
  }
  func.func @transform_1(%arg0: i32, %arg1: i32) -> (i32, i32) {
    %c0_i32 = arith.constant 0 : i32
    %c0_i32_0 = arith.constant 0 : i32
    %c0_i32_1 = arith.constant 0 : i32
    return %c0_i32, %c0_i32_0 : i32, i32
  }
  func.func @transform_2(%arg0: i32, %arg1: i32) -> (i32, i32) {
    %c0_i32 = arith.constant 0 : i32
    %c0_i32_0 = arith.constant 0 : i32
    %c0_i32_1 = arith.constant 0 : i32
    return %c0_i32, %c0_i32_0 : i32, i32
  }
  func.func @transform_3(%arg0: i32, %arg1: i32) -> (i32, i32) {
    %c0_i32 = arith.constant 0 : i32
    %c0_i32_0 = arith.constant 0 : i32
    %c0_i32_1 = arith.constant 0 : i32
    return %c0_i32, %c0_i32_0 : i32, i32
  }
  func.func @transform_4(%arg0: i32, %arg1: i32) -> (i32, i32) {
    %c0_i32 = arith.constant 0 : i32
    %c0_i32_0 = arith.constant 0 : i32
    %c0_i32_1 = arith.constant 0 : i32
    return %c0_i32, %c0_i32_0 : i32, i32
  }
  func.func @transform_5(%arg0: i32, %arg1: i32) -> (i32, i32) {
    %c0_i32 = arith.constant 0 : i32
    %c0_i32_0 = arith.constant 0 : i32
    return %c0_i32, %arg0 : i32, i32
  }
  func.func @transform_6(%arg0: i32, %arg1: i32) -> (i32, i32) {
    %c0_i32 = arith.constant 0 : i32
    %c0_i32_0 = arith.constant 0 : i32
    return %c0_i32, %arg0 : i32, i32
  }
  func.func @transform_7(%arg0: i32, %arg1: i32) -> (i32, i32) {
    %c0_i32 = arith.constant 0 : i32
    return %arg1, %arg0 : i32, i32
  }
}

</mosaic_0001>

<bundles_post_ra>
// kernel: kan_sr_forward.1
= control target key start
LH: loop header
LB: loop body
LE: loop exit
PB: predicated region body
PF: predicated region fallthrough
CT: control target
= control target key end

     0   :  { %s3564_s0 = inlined_call_operand.vmem [shape: f32[8,64], index: 0, kind: input, shape index: {}]   ;;  %s3565_s1 = inlined_call_operand.hbm [shape: f32[64,256], index: 1, kind: input, shape index: {}]   ;;  %s3566_s2 = inlined_call_operand.hbm [shape: f32[1,256], index: 2, kind: input, shape index: {}]   ;;  %s3567_s3 = inlined_call_operand.hbm [shape: f32[256,512], index: 3, kind: input, shape index: {}]   ;;  %s3568_s4 = inlined_call_operand.hbm [shape: f32[1,512], index: 4, kind: input, shape index: {}]   ;;  %s3569_s5 = inlined_call_operand.hbm [shape: f32[512,4096], index: 5, kind: input, shape index: {}]   ;;  %s3570_s6 = inlined_call_operand.hbm [shape: f32[1,4096], index: 6, kind: input, shape index: {}]   ;;  %s3571_s7 = inlined_call_operand.vmem [shape: f32[8,4096], index: 7, kind: output, shape index: {}]  }
   0x1   :  { %3575 = sst [smem:[#allocation16_spill]] %s3564_s0 }
   0x2   :  { %3576 = sst [smem:[#allocation17_spill]] %s3565_s1 }
   0x3   :  { %3577 = sst [smem:[#allocation18_spill]] %s3566_s2 }
   0x4   :  { %3578 = sst [smem:[#allocation19_spill]] %s3567_s3 }
   0x5   :  { %3579 = sst [smem:[#allocation20_spill]] %s3569_s5 }
   0x6   :  { %3580 = sst [smem:[#allocation21_spill]] %s3571_s7 }
   0x7   :  { %12 = vsyncpa [#allocation3], 0 }
   0x8   :  { %13 = vsyncpa [#allocation5], 0 }
   0x9   :  { %14 = vsyncpa [#allocation8], 0  ;;  %s2776_s24 = smov 0   ;;  %s2778_s25 = smov 0  }
   0xa   :  { %s2780_s26 = smov 0   ;;  %s2782_s27 = smov 0  }
   0xb   :  { %s2784_s28 = smov 0   ;;  %s2786_s29 = smov 0  }
   0xc LB: > { %3581 = sst [smem:[#allocation15_spill]] %s2715_s27  ;;  %s3572_s30 = sadd.s32 4294967295, %s2723_s29   ;;  %s2723_s29 = sphi %s2786_s29, %s20_s29   ;;  %s2719_s28 = sphi %s2784_s28, %s3603_s28   ;;  %s2715_s27 = sphi %s2782_s27, %s3602_s27   ;;  %s2711_s26 = sphi %s2780_s26, %s3601_s26   ;;  %s2707_s25 = sphi %s2778_s25, %s3600_s25   ;;  %s2703_s24 = sphi %s2776_s24, %s3599_s24  }
   0xd   : > { %p156_p0 = scmp.ne.s32.totalorder %s2711_s26, %s2707_s25  ;;  %p157_p1 = scmp.eq.s32.totalorder %s2723_s29, 0 }
   0xe   : > { %p162_p2 = scmp.ne.s32.totalorder %s2707_s25, %s2703_s24  ;;  %p2812_p3 = scmp.eq.s32.totalorder %s3572_s30, 0 }
   0xf   : > { %p2816_p4 = por %p157_p1, %p156_p0  ;;  %p2307_p5 = scmp.ge.s32.totalorder %s2723_s29, 1 }
  0x10   : > { %p2823_p6 = por %p2812_p3, %p162_p2  ;;  %p227_p7 = scmp.lt.s32.totalorder %s2723_s29, 5 }
  0x11   : > { %s3585_s1 = sld [smem:[#allocation17_spill]]  ;;  %s2725_s16 = smov [#allocation2]  }
  0x12   : > { %p2831_p8 = pnand %p2307_p5, %p227_p7  ;;  %s247_s17 = sshll.u32 %s2725_s16, 4  ;;  %s248_s17 = int_to_ptr.vmem [resolvable:$true] %s247_s17 }
  0x13   : > { %p2385_p11 = scmp.lt.s32.totalorder %s2723_s29, 4  ;;  %s3588_s2 = sld [smem:[#allocation18_spill]] }
  0x14   : > { %p2361_p9 = pneg %p2831_p8  ;;  %s2726_s22 = smov 256  }
  0x15   : > { %s2727_s23 = smov 16   ;;  %p2851_p12 = pnand %p2385_p11, %p2816_p4 }
  0x16   : > { %p2839_p10 = pnand %p2361_p9, %p2812_p3  ;;  %s2728_s12 = smov [#allocation4]  }
  0x17   : > { %s245_s14 = sshll.u32 %s3585_s1, 4  ;;  %s262_s13 = sshll.u32 %s2728_s12, 4  ;;  %s246_s14 = int_to_ptr.hbm [resolvable:$true] %s245_s14  ;;  %s263_s13 = int_to_ptr.vmem [resolvable:$true] %s262_s13 }
  0x18   : > { %2364 = dma.hbm_to_vmem [thread:$0]  (!%p2839_p10), %s246_s14, 2048, %s248_s17, [#allocation3], %s2726_s22, %s2726_s22, %s2727_s23  }
  0x19   : > { %s260_s21 = sshll.u32 %s3588_s2, 4  ;;  %s299_s16 = sand.u32 1, %s2723_s29   ;;  %s261_s21 = int_to_ptr.hbm [resolvable:$true] %s260_s21 }
  0x1a   : > { %2367 = dma.hbm_to_vmem [thread:$0]  (!%p2839_p10), %s261_s21, 32, %s263_s13, [#allocation5]  }
  0x1b   : > { %s32_s19 = sadd.s32 1, %s2719_s28  ;;  %s3573_s20 = sand.u32 1, %s2711_s26  }
  0x1c   : > { %p34_p13 = scmp.ge.s32.totalorder %s32_s19, 4  ;;  %s2314_s30 = sshll.u32 %s3573_s20, 12 }
  0x1d   : > { %s2340_s8 = sshll.u32 %s2719_s28, 6  ;;  %s3590_s5 = sld [smem:[#allocation20_spill]] }
  0x1e   : > { %s3605_s19 = smov (%p34_p13, %s32_s19), 0  ;;  %s303_s21 = scalar_lea.vmem [#allocation9], %s2314_s30 }
  0x1f   : > { %s146_s22 = ssub.s32 %s2719_s28, %s3605_s19  ;;  %s311_s12 = sshll.u32 %s303_s21, 4  ;;  %s312_s12 = int_to_ptr.vmem [resolvable:$true] %s311_s12 }
  0x20   : > { %p147_p0 = scmp.eq.s32.totalorder %s146_s22, 0  ;;  %s3591_s13 = sadd.s32 1, %s2711_s26 }
  0x21   : > { %s3592_s3 = sld [smem:[#allocation19_spill]]  ;;  %s300_s27 = scalar_lea.sflag [#allocation3], %s299_s16 }
  0x22   : > { %s2873_s1 = scalar_select %p147_p0, %s2711_s26, %s3591_s13  }
  0x23   : > { %s308_s17 = scalar_lea.hbm %s3590_s5, %s2340_s8  ;;  %s2729_s0 = smov 4096  }
  0x24   : > { %s309_s23 = sshll.u32 %s308_s17, 4  ;;  %s2730_s10 = smov 1024   ;;  %s310_s23 = int_to_ptr.hbm [resolvable:$true] %s309_s23 }
  0x25   : > { %s2731_s8 = smov 64   ;;  %s2732_s30 = smov [#allocation6]  }
  0x26   : > { %2377 = dma.hbm_to_vmem [thread:$0]  (!%p2851_p12), %s310_s23, 65536, %s312_s12, %s300_s27, %s2729_s0, %s2730_s10, %s2731_s8  }
  0x27   : > { %s271_s7 = sshll.u32 %s3592_s3, 4  ;;  %s273_s14 = sshll.u32 %s2732_s30, 4  ;;  %s272_s7 = int_to_ptr.hbm [resolvable:$true] %s271_s7  ;;  %s274_s14 = int_to_ptr.vmem [resolvable:$true] %s273_s14 }
  0x28   : > { %s2733_s17 = smov 512   ;;  %s2734_s22 = smov 32  }
  0x29   : > { %2370 = dma.hbm_to_vmem [thread:$0]  (!%p2839_p10), %s272_s7, 16384, %s274_s14, [#allocation5], %s2733_s17, %s2733_s17, %s2734_s22  }
  0x2a   : > { %s286_s16 = sshll.u32 %s3568_s4, 4  ;;  %s2735_s21 = smov [#allocation7]   ;;  %s287_s16 = int_to_ptr.hbm [resolvable:$true] %s286_s16 }
  0x2b   : > { %s288_s13 = sshll.u32 %s2735_s21, 4  ;;  %s3593_s3 = sand.u32 1, %s2711_s26   ;;  %s289_s13 = int_to_ptr.vmem [resolvable:$true] %s288_s13 }
  0x2c   : > { %s2317_s5 = sshll.u32 %s3593_s3, 3  ;;  %s2318_s0 = sshll.u32 %s2719_s28, 3 }
  0x2d   : > { %2373 = dma.hbm_to_vmem [thread:$0]  (!%p2839_p10), %s287_s16, 64, %s289_s13, [#allocation8]  }
  0x2e   : > { %s329_s10 = scalar_lea.hbm %s3570_s6, %s2318_s0  ;;  %s325_s8 = scalar_lea.vmem [#allocation10], %s2317_s5 }
  0x2f   : > { %s333_s30 = sshll.u32 %s325_s8, 4  ;;  %s331_s7 = sshll.u32 %s329_s10, 4  ;;  %s334_s30 = int_to_ptr.vmem [resolvable:$true] %s333_s30  ;;  %s332_s7 = int_to_ptr.hbm [resolvable:$true] %s331_s7 }
  0x30   : > { %2380 = dma.hbm_to_vmem [thread:$0]  (!%p2851_p12), %s332_s7, 128, %s334_s30, %s300_s27  }
  0x31   : > { %342 = sbr.rel (%p2831_p8) target bundleno = 723 (0x2d3), region = 48 }
  0x36   : > { %2686 = dma.done.wait (%p2812_p3), [#allocation3], 2048  }
  0x37   : > { %2688 = vsyncadd (%p2812_p3), [#allocation3], 4294965248 }
  0x38   : > { %2690 = dma.done.wait (%p2812_p3), [#allocation5], 16416  }
  0x39   : > { %2692 = vsyncadd (%p2812_p3), [#allocation5], 4294950880 }
  0x3a   : > { %2694 = dma.done.wait (%p2812_p3), [#allocation8], 64  }
  0x3b   : > { %2696 = vsyncadd (%p2812_p3), [#allocation8], 4294967232  ;;  %s3594_s3 = sadd.s32 4294967295, %s2723_s29   ;;  %s366_s27 = sand.u32 1, %s2707_s25  }
  0x3c   : > { %s364_s5 = sand.u32 1, %s3594_s3   ;;  %s2324_s15 = sshll.u32 %s366_s27, 12 }
  0x3d   : > { %s365_s18 = scalar_lea.sflag [#allocation3], %s364_s5  ;;  %s2914_s24 = scalar_lea.vmem [#allocation9], %s2324_s15 }
  0x3e   : > { %2698 = dma.done.wait (%p2823_p6), %s365_s18, 65664  }
  0x3f   : > { %2700 = vsyncadd (%p2823_p6), %s365_s18, 4294901632  ;;  %v454_v0 = vld [vmem:[#allocation2 + $0x70] sm:$0xff]  ;;  %v455_v1 = vld [vmem:[#allocation2 + $0x78] sm:$0xff]  ;;  %s3595_s14 = sld [smem:[#allocation16_spill]]  ;;  %vm462_vm0 = vcmask 523264   ;;  %s2325_s17 = sshll.u32 %s366_s27, 3 }
  0x40   : > { %v452_v2 = vld [vmem:[#allocation2 + $0x60] sm:$0xff]  ;;  %474 = vmatpush.msra.mxu0 %v454_v0  ;;  %494 = vmatpush.msra.mxu1 %v455_v1  ;;  %v453_v3 = vld [vmem:[#allocation2 + $0x68] sm:$0xff]  ;;  %v450_v4 = vld [vmem:[#allocation2 + $0x50] sm:$0xff]  ;;  %s378_s22 = scalar_lea.vmem [#allocation10], %s2325_s17  ;;  %s3596_s2 = sld [smem:[#allocation15_spill]] }
  0x41   : > { %v451_v5 = vld [vmem:[#allocation2 + $0x58] sm:$0xff]  ;;  %v448_v6 = vld [vmem:[#allocation2 + $0x40] sm:$0xff]  ;;  %v449_v7 = vld [vmem:[#allocation2 + $0x48] sm:$0xff]  ;;  %s3598_s23 = sld [smem:[#allocation21_spill]] }
  0x42   : > { %475 = vmatpush.msra.mxu0 %v452_v2  ;;  %495 = vmatpush.msra.mxu1 %v453_v3  ;;  %v568_v8 = vld [vmem:[#allocation6 + $0x1e0] sm:$0xff]  ;;  %v446_v9 = vld [vmem:[#allocation2 + $0x30] sm:$0xff]  ;;  %v447_v10 = vld [vmem:[#allocation2 + $0x38] sm:$0xff] }
  0x43   : > { %646 = vmatpush.msra.mxu2 %v568_v8  ;;  %v632_v11 = vld [vmem:[#allocation6 + $0x3e0] sm:$0xff]  ;;  %v442_v19 = vld [vmem:[#allocation2 + $0x10] sm:$0xff]  ;;  %v443_v20 = vld [vmem:[#allocation2 + $0x18] sm:$0xff] }
  0x44   : > { %476 = vmatpush.msra.mxu0 %v450_v4  ;;  %496 = vmatpush.msra.mxu1 %v451_v5  ;;  %v564_v12 = vld [vmem:[#allocation6 + $0x1c0] sm:$0xff]  ;;  %v569_v26 = vld [vmem:[#allocation6 + $0x1e8] sm:$0xff] }
  0x45   : > { %v628_v13 = vld [vmem:[#allocation6 + $0x3c0] sm:$0xff]  ;;  %666 = vmatpush.msra.mxu3 %v632_v11  ;;  %647 = vmatpush.msra.mxu2 %v564_v12  ;;  %v633_v27 = vld [vmem:[#allocation6 + $0x3e8] sm:$0xff]  ;;  %v634_v12 = vld [vmem:[#allocation6 + $0x3f0] sm:$0xff] }
  0x46   : > { %477 = vmatpush.msra.mxu0 %v448_v6  ;;  %497 = vmatpush.msra.mxu1 %v449_v7  ;;  %v444_v14 = vld [vmem:[#allocation2 + $0x20] sm:$0xff]  ;;  %v445_v15 = vld [vmem:[#allocation2 + $0x28] sm:$0xff]  ;;  %s2326_s20 = sshll.u32 %s3596_s2, 3 }
  0x47   : > { %v560_v16 = vld [vmem:[#allocation6 + $0x1a0] sm:$0xff]  ;;  %667 = vmatpush.msra.mxu3 %v628_v13  ;;  %v565_v30 = vld [vmem:[#allocation6 + $0x1c8] sm:$0xff]  ;;  %v566_v13 = vld [vmem:[#allocation6 + $0x1d0] sm:$0xff]  ;;  %p3384_p1 = scmp.lt.s32.totalorder %s2326_s20, 31 }
  0x48   : > { %478 = vmatpush.msra.mxu0 %v446_v9  ;;  %498 = vmatpush.msra.mxu1 %v447_v10  ;;  %v624_v17 = vld [vmem:[#allocation6 + $0x3a0] sm:$0xff]  ;;  %v629_v31 = vld [vmem:[#allocation6 + $0x3c8] sm:$0xff]  ;;  %v570_v9 = vld [vmem:[#allocation6 + $0x1f0] sm:$0xff] }
  0x49   : > { %v556_v18 = vld [vmem:[#allocation6 + $0x180] sm:$0xff]  ;;  %648 = vmatpush.msra.mxu2 %v560_v16  ;;  %668 = vmatpush.msra.mxu3 %v624_v17  ;;  %v561_v34 = vld [vmem:[#allocation6 + $0x1a8] sm:$0xff]  ;;  %v630_v16 = vld [vmem:[#allocation6 + $0x3d0] sm:$0xff]  ;;  %s3607_s20 = smov (!%p3384_p1, %s2326_s20), 31 }
  0x4a   : > { %479 = vmatpush.msra.mxu0 %v444_v14  ;;  %499 = vmatpush.msra.mxu1 %v445_v15  ;;  %v620_v21 = vld [vmem:[#allocation6 + $0x380] sm:$0xff]  ;;  %v625_v35 = vld [vmem:[#allocation6 + $0x3a8] sm:$0xff]  ;;  %v562_v17 = vld [vmem:[#allocation6 + $0x1b0] sm:$0xff]  ;;  %s2327_s21 = sshll.u32 %s3607_s20, 3 }
  0x4b   : > { %v552_v22 = vld [vmem:[#allocation6 + $0x160] sm:$0xff]  ;;  %649 = vmatpush.msra.mxu2 %v556_v18  ;;  %669 = vmatpush.msra.mxu3 %v620_v21  ;;  %v557_v38 = vld [vmem:[#allocation6 + $0x188] sm:$0xff]  ;;  %v558_v21 = vld [vmem:[#allocation6 + $0x190] sm:$0xff]  ;;  %s3427_s12 = scalar_lea.vmem %s3598_s23, %s2327_s21 }
  0x4c   : > { %v440_v23 = vld [vmem:[#allocation2] sm:$0xff]  ;;  %v441_v24 = vld [vmem:[#allocation2 + $0x8] sm:$0xff]  ;;  %480 = vmatpush.msra.mxu0 %v442_v19  ;;  %500 = vmatpush.msra.mxu1 %v443_v20  ;;  %v626_v20 = vld [vmem:[#allocation6 + $0x3b0] sm:$0xff] }
  0x4d   : > { %v439_v25 = vld [vmem:[%s3595_s14] sm:$0xff]  ;;  %650 = vmatpush.msra.mxu2 %v552_v22  ;;  %v621_v39 = vld [vmem:[#allocation6 + $0x388] sm:$0xff] }
  0x4e   : > { %481 = vmatpush.msra.mxu0 %v440_v23  ;;  %501 = vmatpush.msra.mxu1 %v441_v24  ;;  %v616_v28 = vld [vmem:[#allocation6 + $0x360] sm:$0xff]  ;;  %v553_v42 = vld [vmem:[#allocation6 + $0x168] sm:$0xff]  ;;  %v571_v24 = vld [vmem:[#allocation6 + $0x1f8] sm:$0xff] }
  0x4f   : > { %v548_v29 = vld [vmem:[#allocation6 + $0x140] sm:$0xff]  ;;  %2328 = vmatmul.msk.f32.vlgmr.msra.gmra.mxu0 %vm462_vm0, %v439_v25  ;;  %2329 = vmatmul.msk.f32.vlgmr.msra.gmra.mxu1 %vm462_vm0, %v439_v25  ;;  %v617_v43 = vld [vmem:[#allocation6 + $0x368] sm:$0xff]  ;;  %v635_v25 = vld [vmem:[#allocation6 + $0x3f8] sm:$0xff] }
  0x50   : > { %686 = vmatpush.msrb.mxu0 %v569_v26  ;;  %706 = vmatpush.msrb.mxu1 %v633_v27  ;;  %v612_v32 = vld [vmem:[#allocation6 + $0x340] sm:$0xff]  ;;  %v549_v46 = vld [vmem:[#allocation6 + $0x148] sm:$0xff]  ;;  %v622_v26 = vld [vmem:[#allocation6 + $0x390] sm:$0xff] }
  0x51   : > { %v544_v33 = vld [vmem:[#allocation6 + $0x120] sm:$0xff]  ;;  %670 = vmatpush.msra.mxu3 %v616_v28  ;;  %651 = vmatpush.msra.mxu2 %v548_v29  ;;  %v613_v47 = vld [vmem:[#allocation6 + $0x348] sm:$0xff]  ;;  %v554_v27 = vld [vmem:[#allocation6 + $0x170] sm:$0xff] }
  0x52   : > { %687 = vmatpush.msrb.mxu0 %v565_v30  ;;  %707 = vmatpush.msrb.mxu1 %v629_v31  ;;  %v608_v36 = vld [vmem:[#allocation6 + $0x320] sm:$0xff]  ;;  %v545_v50 = vld [vmem:[#allocation6 + $0x128] sm:$0xff]  ;;  %v567_v28 = vld [vmem:[#allocation6 + $0x1d8] sm:$0xff] }
  0x53   : > { %v540_v37 = vld [vmem:[#allocation6 + $0x100] sm:$0xff]  ;;  %671 = vmatpush.msra.mxu3 %v612_v32  ;;  %652 = vmatpush.msra.mxu2 %v544_v33  ;;  %v609_v51 = vld [vmem:[#allocation6 + $0x328] sm:$0xff]  ;;  %v631_v29 = vld [vmem:[#allocation6 + $0x3d8] sm:$0xff] }
  0x54   : > { %688 = vmatpush.msrb.mxu0 %v561_v34  ;;  %708 = vmatpush.msrb.mxu1 %v625_v35  ;;  %v604_v40 = vld [vmem:[#allocation6 + $0x300] sm:$0xff]  ;;  %v541_v54 = vld [vmem:[#allocation6 + $0x108] sm:$0xff]  ;;  %v618_v30 = vld [vmem:[#allocation6 + $0x370] sm:$0xff] }
  0x55   : > { %v536_v41 = vld [vmem:[#allocation6 + $0xe0] sm:$0xff]  ;;  %672 = vmatpush.msra.mxu3 %v608_v36  ;;  %653 = vmatpush.msra.mxu2 %v540_v37  ;;  %v605_v55 = vld [vmem:[#allocation6 + $0x308] sm:$0xff]  ;;  %v550_v31 = vld [vmem:[#allocation6 + $0x150] sm:$0xff] }
  0x56   : > { %689 = vmatpush.msrb.mxu0 %v557_v38  ;;  %709 = vmatpush.msrb.mxu1 %v621_v39  ;;  %v600_v44 = vld [vmem:[#allocation6 + $0x2e0] sm:$0xff]  ;;  %v537_v58 = vld [vmem:[#allocation6 + $0xe8] sm:$0xff]  ;;  %v563_v32 = vld [vmem:[#allocation6 + $0x1b8] sm:$0xff] }
  0x57   : > { %v532_v45 = vld [vmem:[#allocation6 + $0xc0] sm:$0xff]  ;;  %673 = vmatpush.msra.mxu3 %v604_v40  ;;  %654 = vmatpush.msra.mxu2 %v536_v41  ;;  %v601_v59 = vld [vmem:[#allocation6 + $0x2e8] sm:$0xff]  ;;  %v627_v33 = vld [vmem:[#allocation6 + $0x3b8] sm:$0xff] }
  0x58   : > { %690 = vmatpush.msrb.mxu0 %v553_v42  ;;  %710 = vmatpush.msrb.mxu1 %v617_v43  ;;  %v596_v48 = vld [vmem:[#allocation6 + $0x2c0] sm:$0xff]  ;;  %v533_v62 = vld [vmem:[#allocation6 + $0xc8] sm:$0xff]  ;;  %v614_v34 = vld [vmem:[#allocation6 + $0x350] sm:$0xff] }
  0x59   : > { %v528_v49 = vld [vmem:[#allocation6 + $0xa0] sm:$0xff]  ;;  %674 = vmatpush.msra.mxu3 %v600_v44  ;;  %655 = vmatpush.msra.mxu2 %v532_v45  ;;  %v597_v63 = vld [vmem:[#allocation6 + $0x2c8] sm:$0xff]  ;;  %v546_v35 = vld [vmem:[#allocation6 + $0x130] sm:$0xff] }
  0x5a   : > { %691 = vmatpush.msrb.mxu0 %v549_v46  ;;  %711 = vmatpush.msrb.mxu1 %v613_v47  ;;  %v592_v52 = vld [vmem:[#allocation6 + $0x2a0] sm:$0xff]  ;;  %v529_v2 = vld [vmem:[#allocation6 + $0xa8] sm:$0xff]  ;;  %v559_v36 = vld [vmem:[#allocation6 + $0x198] sm:$0xff] }
  0x5b   : > { %v524_v53 = vld [vmem:[#allocation6 + $0x80] sm:$0xff]  ;;  %675 = vmatpush.msra.mxu3 %v596_v48  ;;  %656 = vmatpush.msra.mxu2 %v528_v49  ;;  %v593_v3 = vld [vmem:[#allocation6 + $0x2a8] sm:$0xff]  ;;  %v623_v37 = vld [vmem:[#allocation6 + $0x398] sm:$0xff] }
  0x5c   : > { %692 = vmatpush.msrb.mxu0 %v545_v50  ;;  %712 = vmatpush.msrb.mxu1 %v609_v51  ;;  %v588_v56 = vld [vmem:[#allocation6 + $0x280] sm:$0xff]  ;;  %v525_v6 = vld [vmem:[#allocation6 + $0x88] sm:$0xff]  ;;  %v610_v38 = vld [vmem:[#allocation6 + $0x330] sm:$0xff] }
  0x5d   : > { %v520_v57 = vld [vmem:[#allocation6 + $0x60] sm:$0xff]  ;;  %676 = vmatpush.msra.mxu3 %v592_v52  ;;  %657 = vmatpush.msra.mxu2 %v524_v53  ;;  %v589_v7 = vld [vmem:[#allocation6 + $0x288] sm:$0xff]  ;;  %v542_v39 = vld [vmem:[#allocation6 + $0x110] sm:$0xff] }
  0x5e   : > { %693 = vmatpush.msrb.mxu0 %v541_v54  ;;  %713 = vmatpush.msrb.mxu1 %v605_v55  ;;  %v584_v60 = vld [vmem:[#allocation6 + $0x260] sm:$0xff]  ;;  %v521_v10 = vld [vmem:[#allocation6 + $0x68] sm:$0xff]  ;;  %v555_v40 = vld [vmem:[#allocation6 + $0x178] sm:$0xff] }
  0x5f   : > { %v516_v61 = vld [vmem:[#allocation6 + $0x40] sm:$0xff]  ;;  %677 = vmatpush.msra.mxu3 %v588_v56  ;;  %658 = vmatpush.msra.mxu2 %v520_v57  ;;  %v585_v11 = vld [vmem:[#allocation6 + $0x268] sm:$0xff]  ;;  %v619_v41 = vld [vmem:[#allocation6 + $0x378] sm:$0xff] }
  0x60   : > { %694 = vmatpush.msrb.mxu0 %v537_v58  ;;  %714 = vmatpush.msrb.mxu1 %v601_v59  ;;  %v580_v0 = vld [vmem:[#allocation6 + $0x240] sm:$0xff]  ;;  %v517_v14 = vld [vmem:[#allocation6 + $0x48] sm:$0xff]  ;;  %v606_v42 = vld [vmem:[#allocation6 + $0x310] sm:$0xff] }
  0x61   : > { %v512_v1 = vld [vmem:[#allocation6 + $0x20] sm:$0xff]  ;;  %678 = vmatpush.msra.mxu3 %v584_v60  ;;  %659 = vmatpush.msra.mxu2 %v516_v61  ;;  %v581_v15 = vld [vmem:[#allocation6 + $0x248] sm:$0xff]  ;;  %v538_v43 = vld [vmem:[#allocation6 + $0xf0] sm:$0xff] }
  0x62   : > { %695 = vmatpush.msrb.mxu0 %v533_v62  ;;  %715 = vmatpush.msrb.mxu1 %v597_v63  ;;  %v576_v4 = vld [vmem:[#allocation6 + $0x220] sm:$0xff]  ;;  %v513_v18 = vld [vmem:[#allocation6 + $0x28] sm:$0xff]  ;;  %v551_v44 = vld [vmem:[#allocation6 + $0x158] sm:$0xff] }
  0x63   : > { %v508_v5 = vld [vmem:[#allocation6] sm:$0xff]  ;;  %679 = vmatpush.msra.mxu3 %v580_v0  ;;  %660 = vmatpush.msra.mxu2 %v512_v1  ;;  %v577_v19 = vld [vmem:[#allocation6 + $0x228] sm:$0xff]  ;;  %v615_v45 = vld [vmem:[#allocation6 + $0x358] sm:$0xff] }
  0x64   : > { %696 = vmatpush.msrb.mxu0 %v529_v2  ;;  %716 = vmatpush.msrb.mxu1 %v593_v3  ;;  %v572_v8 = vld [vmem:[#allocation6 + $0x200] sm:$0xff]  ;;  %v509_v22 = vld [vmem:[#allocation6 + $0x8] sm:$0xff]  ;;  %v602_v46 = vld [vmem:[#allocation6 + $0x2f0] sm:$0xff] }
  0x65   : > { %680 = vmatpush.msra.mxu3 %v576_v4  ;;  %661 = vmatpush.msra.mxu2 %v508_v5  ;;  %v573_v23 = vld [vmem:[#allocation6 + $0x208] sm:$0xff]  ;;  %v547_v47 = vld [vmem:[#allocation6 + $0x138] sm:$0xff]  ;;  %v534_v53 = vld [vmem:[#allocation6 + $0xd0] sm:$0xff] }
  0x66   : > { %697 = vmatpush.msrb.mxu0 %v525_v6  ;;  %717 = vmatpush.msrb.mxu1 %v589_v7  ;;  %v611_v48 = vld [vmem:[#allocation6 + $0x338] sm:$0xff]  ;;  %v598_v54 = vld [vmem:[#allocation6 + $0x2d0] sm:$0xff] }
  0x67   : > { %681 = vmatpush.msra.mxu3 %v572_v8  ;;  %726 = vmatpush.msrb.mxu2 %v570_v9  ;;  %v543_v49 = vld [vmem:[#allocation6 + $0x118] sm:$0xff]  ;;  %v530_v57 = vld [vmem:[#allocation6 + $0xb0] sm:$0xff] }
  0x68   : > { %698 = vmatpush.msrb.mxu0 %v521_v10  ;;  %718 = vmatpush.msrb.mxu1 %v585_v11  ;;  %v607_v50 = vld [vmem:[#allocation6 + $0x318] sm:$0xff]  ;;  %v594_v58 = vld [vmem:[#allocation6 + $0x2b0] sm:$0xff] }
  0x69   : > { %746 = vmatpush.msrb.mxu3 %v634_v12  ;;  %727 = vmatpush.msrb.mxu2 %v566_v13  ;;  %v539_v51 = vld [vmem:[#allocation6 + $0xf8] sm:$0xff]  ;;  %v526_v61 = vld [vmem:[#allocation6 + $0x90] sm:$0xff] }
  0x6a   : > { %699 = vmatpush.msrb.mxu0 %v517_v14  ;;  %719 = vmatpush.msrb.mxu1 %v581_v15  ;;  %v603_v52 = vld [vmem:[#allocation6 + $0x2f8] sm:$0xff]  ;;  %v590_v62 = vld [vmem:[#allocation6 + $0x290] sm:$0xff] }
  0x6b   : > { %747 = vmatpush.msrb.mxu3 %v630_v16  ;;  %728 = vmatpush.msrb.mxu2 %v562_v17  ;;  %v535_v55 = vld [vmem:[#allocation6 + $0xd8] sm:$0xff]  ;;  %v522_v1 = vld [vmem:[#allocation6 + $0x70] sm:$0xff] }
  0x6c   : > { %700 = vmatpush.msrb.mxu0 %v513_v18  ;;  %720 = vmatpush.msrb.mxu1 %v577_v19  ;;  %v599_v56 = vld [vmem:[#allocation6 + $0x2d8] sm:$0xff]  ;;  %v586_v2 = vld [vmem:[#allocation6 + $0x270] sm:$0xff] }
  0x6d   : > { %748 = vmatpush.msrb.mxu3 %v626_v20  ;;  %729 = vmatpush.msrb.mxu2 %v558_v21  ;;  %v531_v59 = vld [vmem:[#allocation6 + $0xb8] sm:$0xff]  ;;  %v518_v5 = vld [vmem:[#allocation6 + $0x50] sm:$0xff] }
  0x6e   : > { %701 = vmatpush.msrb.mxu0 %v509_v22  ;;  %721 = vmatpush.msrb.mxu1 %v573_v23  ;;  %v595_v60 = vld [vmem:[#allocation6 + $0x2b8] sm:$0xff]  ;;  %v582_v6 = vld [vmem:[#allocation6 + $0x250] sm:$0xff] }
  0x6f   : > { %749 = vmatpush.msrb.mxu3 %v622_v26  ;;  %730 = vmatpush.msrb.mxu2 %v554_v27  ;;  %v527_v63 = vld [vmem:[#allocation6 + $0x98] sm:$0xff]  ;;  %v514_v9 = vld [vmem:[#allocation6 + $0x30] sm:$0xff]  ;;  %v1058_v26 = vld [vmem:[%s2914_s24 + $0x7c0] sm:$0xff] }
  0x70   : > { %766 = vmatpush.msra.mxu0 %v571_v24  ;;  %786 = vmatpush.msra.mxu1 %v635_v25  ;;  %v591_v0 = vld [vmem:[#allocation6 + $0x298] sm:$0xff]  ;;  %v578_v10 = vld [vmem:[#allocation6 + $0x230] sm:$0xff]  ;;  %v930_v27 = vld [vmem:[%s2914_s24 + $0x3c0] sm:$0xff] }
  0x71   : > { %750 = vmatpush.msrb.mxu3 %v618_v30  ;;  %731 = vmatpush.msrb.mxu2 %v550_v31  ;;  %v523_v3 = vld [vmem:[#allocation6 + $0x78] sm:$0xff]  ;;  %v510_v13 = vld [vmem:[#allocation6 + $0x10] sm:$0xff]  ;;  %v1050_v30 = vld [vmem:[%s2914_s24 + $0x780] sm:$0xff] }
  0x72   : > { %767 = vmatpush.msra.mxu0 %v567_v28  ;;  %787 = vmatpush.msra.mxu1 %v631_v29  ;;  %v587_v4 = vld [vmem:[#allocation6 + $0x278] sm:$0xff]  ;;  %v574_v14 = vld [vmem:[#allocation6 + $0x210] sm:$0xff]  ;;  %v1314_v28 = vld [vmem:[%s2914_s24 + $0xfc0] sm:$0xff] }
  0x73   : > { %751 = vmatpush.msrb.mxu3 %v614_v34  ;;  %732 = vmatpush.msrb.mxu2 %v546_v35  ;;  %v519_v7 = vld [vmem:[#allocation6 + $0x58] sm:$0xff]  ;;  %v1186_v29 = vld [vmem:[%s2914_s24 + $0xbc0] sm:$0xff] }
  0x74   : > { %768 = vmatpush.msra.mxu0 %v563_v32  ;;  %788 = vmatpush.msra.mxu1 %v627_v33  ;;  %v583_v8 = vld [vmem:[#allocation6 + $0x258] sm:$0xff]  ;;  %v922_v31 = vld [vmem:[%s2914_s24 + $0x380] sm:$0xff] }
  0x75   : > { %752 = vmatpush.msrb.mxu3 %v610_v38  ;;  %733 = vmatpush.msrb.mxu2 %v542_v39  ;;  %v515_v11 = vld [vmem:[#allocation6 + $0x38] sm:$0xff]  ;;  %v1306_v32 = vld [vmem:[%s2914_s24 + $0xf80] sm:$0xff] }
  0x76   : > { %769 = vmatpush.msra.mxu0 %v559_v36  ;;  %789 = vmatpush.msra.mxu1 %v623_v37  ;;  %v579_v12 = vld [vmem:[#allocation6 + $0x238] sm:$0xff]  ;;  %v1178_v33 = vld [vmem:[%s2914_s24 + $0xb80] sm:$0xff] }
  0x77   : > { %753 = vmatpush.msrb.mxu3 %v606_v42  ;;  %734 = vmatpush.msrb.mxu2 %v538_v43  ;;  %v511_v15 = vld [vmem:[#allocation6 + $0x18] sm:$0xff]  ;;  %v1042_v34 = vld [vmem:[%s2914_s24 + $0x740] sm:$0xff] }
  0x78   : > { %770 = vmatpush.msra.mxu0 %v555_v40  ;;  %790 = vmatpush.msra.mxu1 %v619_v41  ;;  %v575_v16 = vld [vmem:[#allocation6 + $0x218] sm:$0xff]  ;;  %v914_v35 = vld [vmem:[%s2914_s24 + $0x340] sm:$0xff] }
  0x79   : > { %754 = vmatpush.msrb.mxu3 %v602_v46  ;;  %735 = vmatpush.msrb.mxu2 %v534_v53  ;;  %v456_v17 = vld [vmem:[#allocation4] sm:$0x3]  ;;  %v1298_v36 = vld [vmem:[%s2914_s24 + $0xf40] sm:$0xff] }
  0x7a   : > { %771 = vmatpush.msra.mxu0 %v551_v44  ;;  %791 = vmatpush.msra.mxu1 %v615_v45  ;;  %v458_v18 = vperm.slane %v456_v17, 0  ;;  %v459_v19 = vperm.slane %v456_v17, 1  ;;  %v1170_v37 = vld [vmem:[%s2914_s24 + $0xb40] sm:$0xff] }
  0x7b   : > { %755 = vmatpush.msrb.mxu3 %v598_v54  ;;  %736 = vmatpush.msrb.mxu2 %v530_v57  ;;  %v1034_v38 = vld [vmem:[%s2914_s24 + $0x700] sm:$0xff] }
  0x7c   : > { %772 = vmatpush.msra.mxu0 %v547_v47  ;;  %792 = vmatpush.msra.mxu1 %v611_v48  ;;  %v906_v39 = vld [vmem:[%s2914_s24 + $0x300] sm:$0xff] }
  0x7d   : > { %756 = vmatpush.msrb.mxu3 %v594_v58  ;;  %737 = vmatpush.msrb.mxu2 %v526_v61  ;;  %v1290_v40 = vld [vmem:[%s2914_s24 + $0xf00] sm:$0xff] }
  0x7e   : > { %773 = vmatpush.msra.mxu0 %v543_v49  ;;  %793 = vmatpush.msra.mxu1 %v607_v50  ;;  %v1162_v41 = vld [vmem:[%s2914_s24 + $0xb00] sm:$0xff] }
  0x7f   : > { %757 = vmatpush.msrb.mxu3 %v590_v62  ;;  %738 = vmatpush.msrb.mxu2 %v522_v1  ;;  %v1026_v42 = vld [vmem:[%s2914_s24 + $0x6c0] sm:$0xff] }
  0x80   : > { %774 = vmatpush.msra.mxu0 %v539_v51  ;;  %794 = vmatpush.msra.mxu1 %v603_v52  ;;  %v898_v43 = vld [vmem:[%s2914_s24 + $0x2c0] sm:$0xff] }
  0x81   : > { %758 = vmatpush.msrb.mxu3 %v586_v2  ;;  %739 = vmatpush.msrb.mxu2 %v518_v5  ;;  %v1282_v44 = vld [vmem:[%s2914_s24 + $0xec0] sm:$0xff] }
  0x82   : > { %775 = vmatpush.msra.mxu0 %v535_v55  ;;  %795 = vmatpush.msra.mxu1 %v599_v56  ;;  %v1154_v45 = vld [vmem:[%s2914_s24 + $0xac0] sm:$0xff] }
  0x83   : > { %759 = vmatpush.msrb.mxu3 %v582_v6  ;;  %740 = vmatpush.msrb.mxu2 %v514_v9  ;;  %v1018_v46 = vld [vmem:[%s2914_s24 + $0x680] sm:$0xff] }
  0x84   : > { %776 = vmatpush.msra.mxu0 %v531_v59  ;;  %796 = vmatpush.msra.mxu1 %v595_v60  ;;  %v890_v47 = vld [vmem:[%s2914_s24 + $0x280] sm:$0xff] }
  0x85   : > { %760 = vmatpush.msrb.mxu3 %v578_v10  ;;  %741 = vmatpush.msrb.mxu2 %v510_v13  ;;  %v1274_v48 = vld [vmem:[%s2914_s24 + $0xe80] sm:$0xff] }
  0x86   : > { %777 = vmatpush.msra.mxu0 %v527_v63  ;;  %797 = vmatpush.msra.mxu1 %v591_v0  ;;  %v1146_v49 = vld [vmem:[%s2914_s24 + $0xa80] sm:$0xff] }
  0x87   : > { %761 = vmatpush.msrb.mxu3 %v574_v14  ;;  %v1010_v50 = vld [vmem:[%s2914_s24 + $0x640] sm:$0xff] }
  0x88   : > { %778 = vmatpush.msra.mxu0 %v523_v3  ;;  %798 = vmatpush.msra.mxu1 %v587_v4  ;;  %v882_v51 = vld [vmem:[%s2914_s24 + $0x240] sm:$0xff] }
  0x89   : > { %v1266_v52 = vld [vmem:[%s2914_s24 + $0xe40] sm:$0xff] }
  0x8a   : > { %779 = vmatpush.msra.mxu0 %v519_v7  ;;  %799 = vmatpush.msra.mxu1 %v583_v8  ;;  %v1138_v53 = vld [vmem:[%s2914_s24 + $0xa40] sm:$0xff] }
  0x8b   : > { %v1002_v54 = vld [vmem:[%s2914_s24 + $0x600] sm:$0xff] }
  0x8c   : > { %780 = vmatpush.msra.mxu0 %v515_v11  ;;  %800 = vmatpush.msra.mxu1 %v579_v12  ;;  %v874_v55 = vld [vmem:[%s2914_s24 + $0x200] sm:$0xff] }
  0x8d   : > { %v1258_v56 = vld [vmem:[%s2914_s24 + $0xe00] sm:$0xff] }
  0x8e   : > { %781 = vmatpush.msra.mxu0 %v511_v15  ;;  %801 = vmatpush.msra.mxu1 %v575_v16  ;;  %v1130_v57 = vld [vmem:[%s2914_s24 + $0xa00] sm:$0xff] }
  0x8f   : > { %v994_v58 = vld [vmem:[%s2914_s24 + $0x5c0] sm:$0xff] }
  0x90   : > { %v866_v59 = vld [vmem:[%s2914_s24 + $0x1c0] sm:$0xff] }
  0x91   : > { %v1250_v60 = vld [vmem:[%s2914_s24 + $0xdc0] sm:$0xff] }
  0x92   : > { %v1122_v61 = vld [vmem:[%s2914_s24 + $0x9c0] sm:$0xff] }
  0x93   : > { %v986_v62 = vld [vmem:[%s2914_s24 + $0x580] sm:$0xff] }
  0x94   : > { %v858_v63 = vld [vmem:[%s2914_s24 + $0x180] sm:$0xff] }
  0x95   : > { %v1242_v0 = vld [vmem:[%s2914_s24 + $0xd80] sm:$0xff] }
  0x96   : > { %v1114_v1 = vld [vmem:[%s2914_s24 + $0x980] sm:$0xff] }
  0x97   : > { %v978_v2 = vld [vmem:[%s2914_s24 + $0x540] sm:$0xff] }
  0x98   : > { %v850_v3 = vld [vmem:[%s2914_s24 + $0x140] sm:$0xff] }
  0x99   : > { %v1234_v4 = vld [vmem:[%s2914_s24 + $0xd40] sm:$0xff] }
  0x9a   : > { %v1106_v5 = vld [vmem:[%s2914_s24 + $0x940] sm:$0xff] }
  0x9b   : > { %v970_v6 = vld [vmem:[%s2914_s24 + $0x500] sm:$0xff] }
  0x9c   : > { %v842_v7 = vld [vmem:[%s2914_s24 + $0x100] sm:$0xff] }
  0x9d   : > { %v1226_v8 = vld [vmem:[%s2914_s24 + $0xd00] sm:$0xff] }
  0x9e   : > { %v1098_v9 = vld [vmem:[%s2914_s24 + $0x900] sm:$0xff] }
  0x9f   : > { %v962_v10 = vld [vmem:[%s2914_s24 + $0x4c0] sm:$0xff] }
  0xa0   : > { %v834_v11 = vld [vmem:[%s2914_s24 + $0xc0] sm:$0xff] }
  0xa1   : > { %v1218_v12 = vld [vmem:[%s2914_s24 + $0xcc0] sm:$0xff] }
  0xa2   : > { %v1090_v13 = vld [vmem:[%s2914_s24 + $0x8c0] sm:$0xff] }
  0xa3   : > { %v954_v14 = vld [vmem:[%s2914_s24 + $0x480] sm:$0xff] }
  0xa4   : > { %v826_v15 = vld [vmem:[%s2914_s24 + $0x80] sm:$0xff] }
  0xa5   : > { %v1210_v16 = vld [vmem:[%s2914_s24 + $0xc80] sm:$0xff] }
  0xa6   : > { %v1082_v17 = vld [vmem:[%s2914_s24 + $0x880] sm:$0xff] }
  0xcc   : > { %v483_v20 = vpop.f32.mrf.mxu0  ;;  %v503_v21 = vpop.f32.mrf.mxu1 }
  0xcd   : > { %v484_v22 = vadd.f32 %v483_v20, %v458_v18  ;;  %v504_v23 = vadd.f32 %v503_v21, %v459_v19  ;;  %v946_v18 = vld [vmem:[%s2914_s24 + $0x440] sm:$0xff] }
  0xce   : > { %v818_v19 = vld [vmem:[%s2914_s24 + $0x40] sm:$0xff] }
  0xcf   : > { %v506_v24 = vmax.f32 %v484_v22, 0.0  ;;  %v507_v25 = vmax.f32 %v504_v23, 0.0  ;;  %v1202_v20 = vld [vmem:[%s2914_s24 + $0xc40] sm:$0xff] }
  0xd0   : > { %v1074_v21 = vld [vmem:[%s2914_s24 + $0x840] sm:$0xff] }
  0xd1   : > { %662 = vmatmul.f32.vlgmr.msra.gmra.mxu2 %v506_v24  ;;  %682 = vmatmul.f32.vlgmr.msra.gmra.mxu3 %v507_v25  ;;  %v938_v22 = vld [vmem:[%s2914_s24 + $0x400] sm:$0xff] }
  0xd2   : > { %702 = vmatmul.f32.vlgmr.msrb.gmra.mxu0 %v506_v24  ;;  %722 = vmatmul.f32.vlgmr.msrb.gmra.mxu1 %v507_v25  ;;  %v810_v23 = vld [vmem:[%s2914_s24] sm:$0xff] }
  0xd3   : > { %1360 = vmatpush.msra.mxu3 %v1058_v26  ;;  %1340 = vmatpush.msra.mxu2 %v930_v27  ;;  %v1194_v26 = vld [vmem:[%s2914_s24 + $0xc00] sm:$0xff] }
  0xd4   : > { %1400 = vmatpush.msrb.mxu1 %v1314_v28  ;;  %1380 = vmatpush.msrb.mxu0 %v1186_v29  ;;  %v1066_v27 = vld [vmem:[%s2914_s24 + $0x800] sm:$0xff]  ;;  %v1051_v28 = vld [vmem:[%s2914_s24 + $0x788] sm:$0xff] }
  0xd5   : > { %1361 = vmatpush.msra.mxu3 %v1050_v30  ;;  %1341 = vmatpush.msra.mxu2 %v922_v31  ;;  %v923_v29 = vld [vmem:[%s2914_s24 + $0x388] sm:$0xff] }
  0xd6   : > { %1401 = vmatpush.msrb.mxu1 %v1306_v32  ;;  %1381 = vmatpush.msrb.mxu0 %v1178_v33  ;;  %v1315_v30 = vld [vmem:[%s2914_s24 + $0xfc8] sm:$0xff] }
  0xd7   : > { %1362 = vmatpush.msra.mxu3 %v1042_v34  ;;  %1342 = vmatpush.msra.mxu2 %v914_v35  ;;  %v1187_v31 = vld [vmem:[%s2914_s24 + $0xbc8] sm:$0xff] }
  0xd8   : > { %1402 = vmatpush.msrb.mxu1 %v1298_v36  ;;  %1382 = vmatpush.msrb.mxu0 %v1170_v37  ;;  %v1043_v32 = vld [vmem:[%s2914_s24 + $0x748] sm:$0xff] }
  0xd9   : > { %742 = vmatmul.f32.vlgmr.msrb.gmra.mxu2 %v506_v24  ;;  %762 = vmatmul.f32.vlgmr.msrb.gmra.mxu3 %v507_v25  ;;  %v915_v33 = vld [vmem:[%s2914_s24 + $0x348] sm:$0xff] }
  0xda   : > { %782 = vmatmul.f32.vlgmr.msra.gmra.mxu0 %v506_v24  ;;  %802 = vmatmul.f32.vlgmr.msra.gmra.mxu1 %v507_v25  ;;  %v1059_v24 = vld [vmem:[%s2914_s24 + $0x7c8] sm:$0xff] }
  0xdb   : > { %1363 = vmatpush.msra.mxu3 %v1034_v38  ;;  %1343 = vmatpush.msra.mxu2 %v906_v39  ;;  %v931_v25 = vld [vmem:[%s2914_s24 + $0x3c8] sm:$0xff] }
  0xdc   : > { %1403 = vmatpush.msrb.mxu1 %v1290_v40  ;;  %1383 = vmatpush.msrb.mxu0 %v1162_v41  ;;  %v1307_v34 = vld [vmem:[%s2914_s24 + $0xf88] sm:$0xff] }
  0xdd   : > { %1364 = vmatpush.msra.mxu3 %v1026_v42  ;;  %1344 = vmatpush.msra.mxu2 %v898_v43  ;;  %v1179_v35 = vld [vmem:[%s2914_s24 + $0xb88] sm:$0xff] }
  0xde   : > { %1404 = vmatpush.msrb.mxu1 %v1282_v44  ;;  %1384 = vmatpush.msrb.mxu0 %v1154_v45  ;;  %v1035_v36 = vld [vmem:[%s2914_s24 + $0x708] sm:$0xff] }
  0xdf   : > { %1365 = vmatpush.msra.mxu3 %v1018_v46  ;;  %1345 = vmatpush.msra.mxu2 %v890_v47  ;;  %v907_v37 = vld [vmem:[%s2914_s24 + $0x308] sm:$0xff] }
  0xe0   : > { %1405 = vmatpush.msrb.mxu1 %v1274_v48  ;;  %1385 = vmatpush.msrb.mxu0 %v1146_v49  ;;  %v1299_v38 = vld [vmem:[%s2914_s24 + $0xf48] sm:$0xff] }
  0xe1   : > { %1366 = vmatpush.msra.mxu3 %v1010_v50  ;;  %1346 = vmatpush.msra.mxu2 %v882_v51  ;;  %v1171_v39 = vld [vmem:[%s2914_s24 + $0xb48] sm:$0xff] }
  0xe2   : > { %1406 = vmatpush.msrb.mxu1 %v1266_v52  ;;  %1386 = vmatpush.msrb.mxu0 %v1138_v53  ;;  %v1027_v40 = vld [vmem:[%s2914_s24 + $0x6c8] sm:$0xff] }
  0xe3   : > { %1367 = vmatpush.msra.mxu3 %v1002_v54  ;;  %1347 = vmatpush.msra.mxu2 %v874_v55  ;;  %v899_v41 = vld [vmem:[%s2914_s24 + $0x2c8] sm:$0xff] }
  0xe4   : > { %1407 = vmatpush.msrb.mxu1 %v1258_v56  ;;  %1387 = vmatpush.msrb.mxu0 %v1130_v57  ;;  %v1291_v42 = vld [vmem:[%s2914_s24 + $0xf08] sm:$0xff] }
  0xe5   : > { %1368 = vmatpush.msra.mxu3 %v994_v58  ;;  %1348 = vmatpush.msra.mxu2 %v866_v59  ;;  %v1163_v43 = vld [vmem:[%s2914_s24 + $0xb08] sm:$0xff] }
  0xe6   : > { %1408 = vmatpush.msrb.mxu1 %v1250_v60  ;;  %1388 = vmatpush.msrb.mxu0 %v1122_v61  ;;  %v1019_v44 = vld [vmem:[%s2914_s24 + $0x688] sm:$0xff] }
  0xe7   : > { %1369 = vmatpush.msra.mxu3 %v986_v62  ;;  %1349 = vmatpush.msra.mxu2 %v858_v63  ;;  %v891_v45 = vld [vmem:[%s2914_s24 + $0x288] sm:$0xff] }
  0xe8   : > { %1409 = vmatpush.msrb.mxu1 %v1242_v0  ;;  %1389 = vmatpush.msrb.mxu0 %v1114_v1  ;;  %v1283_v46 = vld [vmem:[%s2914_s24 + $0xec8] sm:$0xff] }
  0xe9   : > { %1370 = vmatpush.msra.mxu3 %v978_v2  ;;  %1350 = vmatpush.msra.mxu2 %v850_v3  ;;  %v1155_v47 = vld [vmem:[%s2914_s24 + $0xac8] sm:$0xff] }
  0xea   : > { %1410 = vmatpush.msrb.mxu1 %v1234_v4  ;;  %1390 = vmatpush.msrb.mxu0 %v1106_v5  ;;  %v1011_v48 = vld [vmem:[%s2914_s24 + $0x648] sm:$0xff] }
  0xeb   : > { %1371 = vmatpush.msra.mxu3 %v970_v6  ;;  %1351 = vmatpush.msra.mxu2 %v842_v7  ;;  %v883_v49 = vld [vmem:[%s2914_s24 + $0x248] sm:$0xff] }
  0xec   : > { %1411 = vmatpush.msrb.mxu1 %v1226_v8  ;;  %1391 = vmatpush.msrb.mxu0 %v1098_v9  ;;  %v1275_v50 = vld [vmem:[%s2914_s24 + $0xe88] sm:$0xff] }
  0xed   : > { %1372 = vmatpush.msra.mxu3 %v962_v10  ;;  %1352 = vmatpush.msra.mxu2 %v834_v11  ;;  %v1003_v51 = vld [vmem:[%s2914_s24 + $0x608] sm:$0xff] }
  0xee   : > { %1412 = vmatpush.msrb.mxu1 %v1218_v12  ;;  %1392 = vmatpush.msrb.mxu0 %v1090_v13  ;;  %v875_v52 = vld [vmem:[%s2914_s24 + $0x208] sm:$0xff] }
  0xef   : > { %1373 = vmatpush.msra.mxu3 %v954_v14  ;;  %1353 = vmatpush.msra.mxu2 %v826_v15  ;;  %v1267_v53 = vld [vmem:[%s2914_s24 + $0xe48] sm:$0xff] }
  0xf0   : > { %1413 = vmatpush.msrb.mxu1 %v1210_v16  ;;  %1393 = vmatpush.msrb.mxu0 %v1082_v17  ;;  %v995_v54 = vld [vmem:[%s2914_s24 + $0x5c8] sm:$0xff] }
  0xf1   : > { %1374 = vmatpush.msra.mxu3 %v946_v18  ;;  %1354 = vmatpush.msra.mxu2 %v818_v19  ;;  %v867_v55 = vld [vmem:[%s2914_s24 + $0x1c8] sm:$0xff] }
  0xf2   : > { %1414 = vmatpush.msrb.mxu1 %v1202_v20  ;;  %1394 = vmatpush.msrb.mxu0 %v1074_v21  ;;  %v1259_v56 = vld [vmem:[%s2914_s24 + $0xe08] sm:$0xff] }
  0xf3   : > { %1375 = vmatpush.msra.mxu3 %v938_v22  ;;  %1355 = vmatpush.msra.mxu2 %v810_v23  ;;  %v987_v57 = vld [vmem:[%s2914_s24 + $0x588] sm:$0xff] }
  0xf4   : > { %1415 = vmatpush.msrb.mxu1 %v1194_v26  ;;  %1395 = vmatpush.msrb.mxu0 %v1066_v27  ;;  %v979_v58 = vld [vmem:[%s2914_s24 + $0x548] sm:$0xff]  ;;  %v636_v26 = vld [vmem:[#allocation7] sm:$0xf] }
  0xf5   : > { %1440 = vmatpush.msrb.mxu3 %v1059_v24  ;;  %1420 = vmatpush.msrb.mxu2 %v931_v25  ;;  %v971_v59 = vld [vmem:[%s2914_s24 + $0x508] sm:$0xff]  ;;  %v639_v27 = vperm.slane %v636_v26, 1 }
  0xf6   : > { %1480 = vmatpush.msra.mxu1 %v1315_v30  ;;  %1460 = vmatpush.msra.mxu0 %v1187_v31  ;;  %v859_v60 = vld [vmem:[%s2914_s24 + $0x188] sm:$0xff]  ;;  %v638_v31 = vperm.slane %v636_v26, 0 }
  0xf7   : > { %1441 = vmatpush.msrb.mxu3 %v1051_v28  ;;  %1421 = vmatpush.msrb.mxu2 %v923_v29  ;;  %v963_v61 = vld [vmem:[%s2914_s24 + $0x4c8] sm:$0xff] }
  0xf8   : > { %1481 = vmatpush.msra.mxu1 %v1307_v34  ;;  %1461 = vmatpush.msra.mxu0 %v1179_v35  ;;  %v1147_v62 = vld [vmem:[%s2914_s24 + $0xa88] sm:$0xff] }
  0xf9   : > { %1442 = vmatpush.msrb.mxu3 %v1043_v32  ;;  %1422 = vmatpush.msrb.mxu2 %v915_v33  ;;  %v1251_v63 = vld [vmem:[%s2914_s24 + $0xdc8] sm:$0xff] }
  0xfa   : > { %1482 = vmatpush.msra.mxu1 %v1299_v38  ;;  %1462 = vmatpush.msra.mxu0 %v1171_v39  ;;  %v851_v0 = vld [vmem:[%s2914_s24 + $0x148] sm:$0xff]  ;;  %v1052_v39 = vld [vmem:[%s2914_s24 + $0x790] sm:$0xff] }
  0xfb   : > { %1443 = vmatpush.msrb.mxu3 %v1035_v36  ;;  %1423 = vmatpush.msrb.mxu2 %v907_v37  ;;  %v955_v1 = vld [vmem:[%s2914_s24 + $0x488] sm:$0xff]  ;;  %v1060_v36 = vld [vmem:[%s2914_s24 + $0x7d0] sm:$0xff]  ;;  %v641_v37 = vperm.slane %v636_v26, 3 }
  0xfc   : > { %1483 = vmatpush.msra.mxu1 %v1291_v42  ;;  %1463 = vmatpush.msra.mxu0 %v1163_v43  ;;  %v1139_v2 = vld [vmem:[%s2914_s24 + $0xa48] sm:$0xff]  ;;  %v1044_v43 = vld [vmem:[%s2914_s24 + $0x750] sm:$0xff] }
  0xfd   : > { %1444 = vmatpush.msrb.mxu3 %v1027_v40  ;;  %1424 = vmatpush.msrb.mxu2 %v899_v41  ;;  %v1243_v3 = vld [vmem:[%s2914_s24 + $0xd88] sm:$0xff] }
  0xfe   : > { %1484 = vmatpush.msra.mxu1 %v1283_v46  ;;  %1464 = vmatpush.msra.mxu0 %v1155_v47  ;;  %v843_v4 = vld [vmem:[%s2914_s24 + $0x108] sm:$0xff]  ;;  %v932_v46 = vld [vmem:[%s2914_s24 + $0x3d0] sm:$0xff]  ;;  %v640_v47 = vperm.slane %v636_v26, 2 }
  0xff   : > { %1445 = vmatpush.msrb.mxu3 %v1019_v44  ;;  %1425 = vmatpush.msrb.mxu2 %v891_v45  ;;  %v947_v5 = vld [vmem:[%s2914_s24 + $0x448] sm:$0xff]  ;;  %v956_v26 = vld [vmem:[%s2914_s24 + $0x490] sm:$0xff] }
 0x100   : > { %1485 = vmatpush.msra.mxu1 %v1275_v50  ;;  %1465 = vmatpush.msra.mxu0 %v1147_v62  ;;  %v1131_v6 = vld [vmem:[%s2914_s24 + $0xa08] sm:$0xff]  ;;  %v1012_v62 = vld [vmem:[%s2914_s24 + $0x650] sm:$0xff] }
 0x101   : > { %1446 = vmatpush.msrb.mxu3 %v1011_v48  ;;  %1426 = vmatpush.msrb.mxu2 %v883_v49  ;;  %v1235_v7 = vld [vmem:[%s2914_s24 + $0xd48] sm:$0xff]  ;;  %v1036_v49 = vld [vmem:[%s2914_s24 + $0x710] sm:$0xff] }
 0x102   : > { %1486 = vmatpush.msra.mxu1 %v1267_v53  ;;  %1466 = vmatpush.msra.mxu0 %v1139_v2  ;;  %v835_v8 = vld [vmem:[%s2914_s24 + $0xc8] sm:$0xff]  ;;  %v1028_v53 = vld [vmem:[%s2914_s24 + $0x6d0] sm:$0xff] }
 0x103   : > { %1447 = vmatpush.msrb.mxu3 %v1003_v51  ;;  %1427 = vmatpush.msrb.mxu2 %v875_v52  ;;  %v939_v9 = vld [vmem:[%s2914_s24 + $0x408] sm:$0xff]  ;;  %v924_v52 = vld [vmem:[%s2914_s24 + $0x390] sm:$0xff] }
 0x104   : > { %1487 = vmatpush.msra.mxu1 %v1259_v56  ;;  %1467 = vmatpush.msra.mxu0 %v1131_v6  ;;  %v1123_v10 = vld [vmem:[%s2914_s24 + $0x9c8] sm:$0xff]  ;;  %v900_v2 = vld [vmem:[%s2914_s24 + $0x2d0] sm:$0xff] }
 0x105   : > { %1448 = vmatpush.msrb.mxu3 %v995_v54  ;;  %1428 = vmatpush.msrb.mxu2 %v867_v55  ;;  %v1227_v11 = vld [vmem:[%s2914_s24 + $0xd08] sm:$0xff]  ;;  %v1316_v55 = vld [vmem:[%s2914_s24 + $0xfd0] sm:$0xff] }
 0x106   : > { %1488 = vmatpush.msra.mxu1 %v1251_v63  ;;  %1468 = vmatpush.msra.mxu0 %v1123_v10  ;;  %v827_v12 = vld [vmem:[%s2914_s24 + $0x88] sm:$0xff]  ;;  %v892_v6 = vld [vmem:[%s2914_s24 + $0x290] sm:$0xff] }
 0x107   : > { %1449 = vmatpush.msrb.mxu3 %v987_v57  ;;  %1429 = vmatpush.msrb.mxu2 %v859_v60  ;;  %v1115_v13 = vld [vmem:[%s2914_s24 + $0x988] sm:$0xff]  ;;  %v916_v57 = vld [vmem:[%s2914_s24 + $0x350] sm:$0xff] }
 0x108   : > { %1489 = vmatpush.msra.mxu1 %v1243_v3  ;;  %v1219_v14 = vld [vmem:[%s2914_s24 + $0xcc8] sm:$0xff]  ;;  %1469 = vmatpush.msra.mxu0 %v1115_v13  ;;  %v1308_v60 = vld [vmem:[%s2914_s24 + $0xf90] sm:$0xff] }
 0x109   : > { %1450 = vmatpush.msrb.mxu3 %v979_v58  ;;  %1430 = vmatpush.msrb.mxu2 %v851_v0  ;;  %v819_v15 = vld [vmem:[%s2914_s24 + $0x48] sm:$0xff]  ;;  %v1020_v58 = vld [vmem:[%s2914_s24 + $0x690] sm:$0xff] }
 0x10a   : > { %1490 = vmatpush.msra.mxu1 %v1235_v7  ;;  %v1107_v16 = vld [vmem:[%s2914_s24 + $0x948] sm:$0xff]  ;;  %v1300_v0 = vld [vmem:[%s2914_s24 + $0xf50] sm:$0xff] }
 0x10b   : > { %1451 = vmatpush.msrb.mxu3 %v971_v59  ;;  %1431 = vmatpush.msrb.mxu2 %v843_v4  ;;  %v1211_v17 = vld [vmem:[%s2914_s24 + $0xc88] sm:$0xff]  ;;  %v1188_v3 = vld [vmem:[%s2914_s24 + $0xbd0] sm:$0xff] }
 0x10c   : > { %1491 = vmatpush.msra.mxu1 %v1227_v11  ;;  %1470 = vmatpush.msra.mxu0 %v1107_v16  ;;  %v811_v18 = vld [vmem:[%s2914_s24 + $0x8] sm:$0xff]  ;;  %v1292_v4 = vld [vmem:[%s2914_s24 + $0xf10] sm:$0xff] }
 0x10d   : > { %1452 = vmatpush.msrb.mxu3 %v963_v61  ;;  %1432 = vmatpush.msrb.mxu2 %v835_v8  ;;  %v1099_v19 = vld [vmem:[%s2914_s24 + $0x908] sm:$0xff]  ;;  %v908_v61 = vld [vmem:[%s2914_s24 + $0x310] sm:$0xff] }
 0x10e   : > { %1492 = vmatpush.msra.mxu1 %v1219_v14  ;;  %v1203_v20 = vld [vmem:[%s2914_s24 + $0xc48] sm:$0xff]  ;;  %1471 = vmatpush.msra.mxu0 %v1099_v19  ;;  %v1180_v7 = vld [vmem:[%s2914_s24 + $0xb90] sm:$0xff] }
 0x10f   : > { %1453 = vmatpush.msrb.mxu3 %v955_v1  ;;  %1433 = vmatpush.msrb.mxu2 %v827_v12  ;;  %v1091_v21 = vld [vmem:[%s2914_s24 + $0x8c8] sm:$0xff]  ;;  %v1004_v1 = vld [vmem:[%s2914_s24 + $0x610] sm:$0xff] }
 0x110   : > { %1493 = vmatpush.msra.mxu1 %v1211_v17  ;;  %v1195_v22 = vld [vmem:[%s2914_s24 + $0xc08] sm:$0xff]  ;;  %1472 = vmatpush.msra.mxu0 %v1091_v21  ;;  %v1284_v8 = vld [vmem:[%s2914_s24 + $0xed0] sm:$0xff] }
 0x111   : > { %1454 = vmatpush.msrb.mxu3 %v947_v5  ;;  %1434 = vmatpush.msrb.mxu2 %v819_v15  ;;  %v1083_v23 = vld [vmem:[%s2914_s24 + $0x888] sm:$0xff]  ;;  %v996_v5 = vld [vmem:[%s2914_s24 + $0x5d0] sm:$0xff] }
 0x112   : > { %1494 = vmatpush.msra.mxu1 %v1203_v20  ;;  %1473 = vmatpush.msra.mxu0 %v1083_v23  ;;  %v1075_v24 = vld [vmem:[%s2914_s24 + $0x848] sm:$0xff]  ;;  %v988_v10 = vld [vmem:[%s2914_s24 + $0x590] sm:$0xff] }
 0x113   : > { %1455 = vmatpush.msrb.mxu3 %v939_v9  ;;  %1435 = vmatpush.msrb.mxu2 %v811_v18  ;;  %v1067_v25 = vld [vmem:[%s2914_s24 + $0x808] sm:$0xff]  ;;  %v884_v9 = vld [vmem:[%s2914_s24 + $0x250] sm:$0xff] }
 0x114   : > { %1495 = vmatpush.msra.mxu1 %v1195_v22  ;;  %1474 = vmatpush.msra.mxu0 %v1075_v24  ;;  %v1172_v11 = vld [vmem:[%s2914_s24 + $0xb50] sm:$0xff] }
 0x115   : > { %v1276_v12 = vld [vmem:[%s2914_s24 + $0xe90] sm:$0xff] }
 0x116   : > { %1475 = vmatpush.msra.mxu0 %v1067_v25  ;;  %v876_v13 = vld [vmem:[%s2914_s24 + $0x210] sm:$0xff] }
 0x117   : > { %v980_v14 = vld [vmem:[%s2914_s24 + $0x550] sm:$0xff] }
 0x118   : > { %v1164_v15 = vld [vmem:[%s2914_s24 + $0xb10] sm:$0xff] }
 0x119   : > { %v1268_v16 = vld [vmem:[%s2914_s24 + $0xe50] sm:$0xff] }
 0x11a   : > { %v868_v17 = vld [vmem:[%s2914_s24 + $0x1d0] sm:$0xff] }
 0x11b   : > { %v972_v18 = vld [vmem:[%s2914_s24 + $0x510] sm:$0xff] }
 0x11c   : > { %v1156_v19 = vld [vmem:[%s2914_s24 + $0xad0] sm:$0xff] }
 0x11d   : > { %v1260_v20 = vld [vmem:[%s2914_s24 + $0xe10] sm:$0xff] }
 0x11e   : > { %v860_v21 = vld [vmem:[%s2914_s24 + $0x190] sm:$0xff] }
 0x11f   : > { %v964_v22 = vld [vmem:[%s2914_s24 + $0x4d0] sm:$0xff] }
 0x120   : > { %v1148_v23 = vld [vmem:[%s2914_s24 + $0xa90] sm:$0xff] }
 0x121   : > { %v1252_v24 = vld [vmem:[%s2914_s24 + $0xdd0] sm:$0xff] }
 0x122   : > { %v852_v25 = vld [vmem:[%s2914_s24 + $0x150] sm:$0xff] }
 0x14f   : > { %v703_v28 = vpop.f32.mrf.mxu0  ;;  %v723_v29 = vpop.f32.mrf.mxu1 }
 0x150   : > { %v704_v30 = vadd.f32 %v703_v28, %v639_v27  ;;  %v1140_v27 = vld [vmem:[%s2914_s24 + $0xa50] sm:$0xff] }
 0x151   : > { %v1244_v28 = vld [vmem:[%s2914_s24 + $0xd90] sm:$0xff] }
 0x152   : > { %v724_v32 = vadd.f32 %v723_v29, %v704_v30  ;;  %v844_v29 = vld [vmem:[%s2914_s24 + $0x110] sm:$0xff] }
 0x153   : > { %v948_v30 = vld [vmem:[%s2914_s24 + $0x450] sm:$0xff] }
 0x154   : > { %v3051_v33 = vmax.f32 %v724_v32, 0.0  ;;  %v663_v34 = vpop.f32.mrf.mxu2  ;;  %v683_v35 = vpop.f32.mrf.mxu3  ;;  %v1236_v32 = vld [vmem:[%s2914_s24 + $0xd50] sm:$0xff] }
 0x155   : > { %v664_v38 = vadd.f32 %v663_v34, %v638_v31  ;;  %v1132_v31 = vld [vmem:[%s2914_s24 + $0xa10] sm:$0xff] }
 0x156   : > { %1376 = vmatmul.f32.vlgmr.msra.gmra.mxu3 %v3051_v33  ;;  %v836_v34 = vld [vmem:[%s2914_s24 + $0xd0] sm:$0xff] }
 0x157   : > { %v684_v40 = vadd.f32 %v683_v35, %v664_v38  ;;  %1520 = vmatpush.msra.mxu3 %v1060_v36  ;;  %v783_v41 = vpop.f32.mrf.mxu0  ;;  %v803_v45 = vpop.f32.mrf.mxu1  ;;  %v940_v35 = vld [vmem:[%s2914_s24 + $0x410] sm:$0xff]  ;;  %v1061_v38 = vld [vmem:[%s2914_s24 + $0x7d8] sm:$0xff] }
 0x158   : > { %v784_v42 = vadd.f32 %v783_v41, %v641_v37  ;;  %v1124_v36 = vld [vmem:[%s2914_s24 + $0x9d0] sm:$0xff] }
 0x159   : > { %v3057_v44 = vmax.f32 %v684_v40, 0.0  ;;  %1521 = vmatpush.msra.mxu3 %v1052_v39  ;;  %v1228_v37 = vld [vmem:[%s2914_s24 + $0xd10] sm:$0xff] }
 0x15a   : > { %v804_v48 = vadd.f32 %v803_v45, %v784_v42  ;;  %v828_v39 = vld [vmem:[%s2914_s24 + $0x90] sm:$0xff]  ;;  %v1053_v42 = vld [vmem:[%s2914_s24 + $0x798] sm:$0xff] }
 0x15b   : > { %1522 = vmatpush.msra.mxu3 %v1044_v43  ;;  %1356 = vmatmul.f32.vlgmr.msra.gmra.mxu2 %v3057_v44  ;;  %v1116_v40 = vld [vmem:[%s2914_s24 + $0x990] sm:$0xff] }
 0x15c   : > { %v3062_v50 = vmax.f32 %v804_v48, 0.0  ;;  %1500 = vmatpush.msra.mxu2 %v932_v46  ;;  %v743_v51 = vpop.f32.mrf.mxu2  ;;  %v763_v56 = vpop.f32.mrf.mxu3  ;;  %v1220_v41 = vld [vmem:[%s2914_s24 + $0xcd0] sm:$0xff] }
 0x15d   : > { %1523 = vmatpush.msra.mxu3 %v1036_v49  ;;  %v744_v54 = vadd.f32 %v743_v51, %v640_v47  ;;  %v820_v43 = vld [vmem:[%s2914_s24 + $0x50] sm:$0xff]  ;;  %v1045_v47 = vld [vmem:[%s2914_s24 + $0x758] sm:$0xff] }
 0x15e   : > { %1416 = vmatmul.f32.vlgmr.msrb.gmra.mxu1 %v3062_v50  ;;  %1456 = vmatmul.f32.vlgmr.msrb.gmra.mxu3 %v3051_v33  ;;  %v1108_v45 = vld [vmem:[%s2914_s24 + $0x950] sm:$0xff] }
 0x15f   : > { %v764_v59 = vadd.f32 %v763_v56, %v744_v54  ;;  %1501 = vmatpush.msra.mxu2 %v924_v52  ;;  %1524 = vmatpush.msra.mxu3 %v1028_v53  ;;  %v1212_v46 = vld [vmem:[%s2914_s24 + $0xc90] sm:$0xff]  ;;  %v1037_v52 = vld [vmem:[%s2914_s24 + $0x718] sm:$0xff] }
 0x160   : > { %1560 = vmatpush.msrb.mxu1 %v1316_v55  ;;  %v812_v48 = vld [vmem:[%s2914_s24 + $0x10] sm:$0xff]  ;;  %v933_v53 = vld [vmem:[%s2914_s24 + $0x3d8] sm:$0xff] }
 0x161   : > { %v3074_v63 = vmax.f32 %v764_v59, 0.0  ;;  %1502 = vmatpush.msra.mxu2 %v916_v57  ;;  %1525 = vmatpush.msra.mxu3 %v1020_v58  ;;  %v1100_v49 = vld [vmem:[%s2914_s24 + $0x910] sm:$0xff]  ;;  %v1029_v56 = vld [vmem:[%s2914_s24 + $0x6d8] sm:$0xff] }
 0x162   : > { %1561 = vmatpush.msrb.mxu1 %v1308_v60  ;;  %v1204_v51 = vld [vmem:[%s2914_s24 + $0xc50] sm:$0xff]  ;;  %v925_v57 = vld [vmem:[%s2914_s24 + $0x398] sm:$0xff] }
 0x163   : > { %1503 = vmatpush.msra.mxu2 %v908_v61  ;;  %1526 = vmatpush.msra.mxu3 %v1012_v62  ;;  %v1092_v54 = vld [vmem:[%s2914_s24 + $0x8d0] sm:$0xff]  ;;  %v1317_v58 = vld [vmem:[%s2914_s24 + $0xfd8] sm:$0xff] }
 0x164   : > { %1562 = vmatpush.msrb.mxu1 %v1300_v0  ;;  %1396 = vmatmul.f32.vlgmr.msrb.gmra.mxu0 %v3074_v63  ;;  %v1196_v55 = vld [vmem:[%s2914_s24 + $0xc10] sm:$0xff]  ;;  %v917_v60 = vld [vmem:[%s2914_s24 + $0x358] sm:$0xff] }
 0x165   : > { %1436 = vmatmul.f32.vlgmr.msrb.gmra.mxu2 %v3057_v44  ;;  %1527 = vmatpush.msra.mxu3 %v1004_v1  ;;  %v1084_v59 = vld [vmem:[%s2914_s24 + $0x890] sm:$0xff]  ;;  %v1021_v61 = vld [vmem:[%s2914_s24 + $0x698] sm:$0xff] }
 0x166   : > { %1504 = vmatpush.msra.mxu2 %v900_v2  ;;  %1540 = vmatpush.msrb.mxu0 %v1188_v3  ;;  %v1309_v62 = vld [vmem:[%s2914_s24 + $0xf98] sm:$0xff]  ;;  %v1076_v0 = vld [vmem:[%s2914_s24 + $0x850] sm:$0xff] }
 0x167   : > { %1563 = vmatpush.msrb.mxu1 %v1292_v4  ;;  %1528 = vmatpush.msra.mxu3 %v996_v5  ;;  %v909_v1 = vld [vmem:[%s2914_s24 + $0x318] sm:$0xff]  ;;  %v1068_v4 = vld [vmem:[%s2914_s24 + $0x810] sm:$0xff] }
 0x168   : > { %1496 = vmatmul.f32.vlgmr.msra.gmra.mxu1 %v3062_v50  ;;  %1505 = vmatpush.msra.mxu2 %v892_v6  ;;  %v1013_v2 = vld [vmem:[%s2914_s24 + $0x658] sm:$0xff] }
 0x169   : > { %1541 = vmatpush.msrb.mxu0 %v1180_v7  ;;  %1564 = vmatpush.msrb.mxu1 %v1284_v8  ;;  %v1301_v3 = vld [vmem:[%s2914_s24 + $0xf58] sm:$0xff] }
 0x16a   : > { %1506 = vmatpush.msra.mxu2 %v884_v9  ;;  %1529 = vmatpush.msra.mxu3 %v988_v10  ;;  %v901_v5 = vld [vmem:[%s2914_s24 + $0x2d8] sm:$0xff] }
 0x16b   : > { %1542 = vmatpush.msrb.mxu0 %v1172_v11  ;;  %1565 = vmatpush.msrb.mxu1 %v1276_v12  ;;  %v1005_v6 = vld [vmem:[%s2914_s24 + $0x618] sm:$0xff] }
 0x16c   : > { %1507 = vmatpush.msra.mxu2 %v876_v13  ;;  %1530 = vmatpush.msra.mxu3 %v980_v14  ;;  %v1189_v7 = vld [vmem:[%s2914_s24 + $0xbd8] sm:$0xff] }
 0x16d   : > { %1543 = vmatpush.msrb.mxu0 %v1164_v15  ;;  %1566 = vmatpush.msrb.mxu1 %v1268_v16  ;;  %v1293_v8 = vld [vmem:[%s2914_s24 + $0xf18] sm:$0xff] }
 0x16e   : > { %1476 = vmatmul.f32.vlgmr.msra.gmra.mxu0 %v3074_v63  ;;  %1508 = vmatpush.msra.mxu2 %v868_v17  ;;  %v893_v9 = vld [vmem:[%s2914_s24 + $0x298] sm:$0xff] }
 0x16f   : > { %1531 = vmatpush.msra.mxu3 %v972_v18  ;;  %1544 = vmatpush.msrb.mxu0 %v1156_v19  ;;  %v997_v10 = vld [vmem:[%s2914_s24 + $0x5d8] sm:$0xff] }
 0x170   : > { %1567 = vmatpush.msrb.mxu1 %v1260_v20  ;;  %1509 = vmatpush.msra.mxu2 %v860_v21  ;;  %v1181_v11 = vld [vmem:[%s2914_s24 + $0xb98] sm:$0xff] }
 0x171   : > { %1532 = vmatpush.msra.mxu3 %v964_v22  ;;  %1545 = vmatpush.msrb.mxu0 %v1148_v23  ;;  %v1285_v12 = vld [vmem:[%s2914_s24 + $0xed8] sm:$0xff] }
 0x172   : > { %1568 = vmatpush.msrb.mxu1 %v1252_v24  ;;  %1510 = vmatpush.msra.mxu2 %v852_v25  ;;  %v885_v13 = vld [vmem:[%s2914_s24 + $0x258] sm:$0xff] }
 0x173   : > { %1533 = vmatpush.msra.mxu3 %v956_v26  ;;  %1546 = vmatpush.msrb.mxu0 %v1140_v27  ;;  %v989_v14 = vld [vmem:[%s2914_s24 + $0x598] sm:$0xff] }
 0x174   : > { %1569 = vmatpush.msrb.mxu1 %v1244_v28  ;;  %1511 = vmatpush.msra.mxu2 %v844_v29  ;;  %v1173_v15 = vld [vmem:[%s2914_s24 + $0xb58] sm:$0xff] }
 0x175   : > { %1534 = vmatpush.msra.mxu3 %v948_v30  ;;  %1547 = vmatpush.msrb.mxu0 %v1132_v31  ;;  %v1277_v16 = vld [vmem:[%s2914_s24 + $0xe98] sm:$0xff] }
 0x176   : > { %1570 = vmatpush.msrb.mxu1 %v1236_v32  ;;  %1512 = vmatpush.msra.mxu2 %v836_v34  ;;  %v877_v17 = vld [vmem:[%s2914_s24 + $0x218] sm:$0xff] }
 0x177   : > { %1535 = vmatpush.msra.mxu3 %v940_v35  ;;  %1548 = vmatpush.msrb.mxu0 %v1124_v36  ;;  %v981_v18 = vld [vmem:[%s2914_s24 + $0x558] sm:$0xff] }
 0x178   : > { %1571 = vmatpush.msrb.mxu1 %v1228_v37  ;;  %1536 = vmatmul.f32.vlgmr.msra.gmra.mxu3 %v3051_v33  ;;  %v1165_v19 = vld [vmem:[%s2914_s24 + $0xb18] sm:$0xff] }
 0x179   : > { %1600 = vmatpush.msrb.mxu3 %v1061_v38  ;;  %1513 = vmatpush.msra.mxu2 %v828_v39  ;;  %v1269_v20 = vld [vmem:[%s2914_s24 + $0xe58] sm:$0xff] }
 0x17a   : > { %1549 = vmatpush.msrb.mxu0 %v1116_v40  ;;  %1572 = vmatpush.msrb.mxu1 %v1220_v41  ;;  %v869_v21 = vld [vmem:[%s2914_s24 + $0x1d8] sm:$0xff] }
 0x17b   : > { %1601 = vmatpush.msrb.mxu3 %v1053_v42  ;;  %1514 = vmatpush.msra.mxu2 %v820_v43  ;;  %v973_v22 = vld [vmem:[%s2914_s24 + $0x518] sm:$0xff]  ;;  %v1062_v42 = vld [vmem:[%s2914_s24 + $0x7e0] sm:$0xff] }
 0x17c   : > { %1550 = vmatpush.msrb.mxu0 %v1108_v45  ;;  %1573 = vmatpush.msrb.mxu1 %v1212_v46  ;;  %v1157_v23 = vld [vmem:[%s2914_s24 + $0xad8] sm:$0xff] }
 0x17d   : > { %1602 = vmatpush.msrb.mxu3 %v1045_v47  ;;  %1515 = vmatpush.msra.mxu2 %v812_v48  ;;  %v1261_v24 = vld [vmem:[%s2914_s24 + $0xe18] sm:$0xff]  ;;  %v1054_v47 = vld [vmem:[%s2914_s24 + $0x7a0] sm:$0xff] }
 0x17e   : > { %1551 = vmatpush.msrb.mxu0 %v1100_v49  ;;  %1574 = vmatpush.msrb.mxu1 %v1204_v51  ;;  %v861_v25 = vld [vmem:[%s2914_s24 + $0x198] sm:$0xff] }
 0x17f   : > { %1516 = vmatmul.f32.vlgmr.msra.gmra.mxu2 %v3057_v44  ;;  %1603 = vmatpush.msrb.mxu3 %v1037_v52  ;;  %v965_v26 = vld [vmem:[%s2914_s24 + $0x4d8] sm:$0xff]  ;;  %v1046_v52 = vld [vmem:[%s2914_s24 + $0x760] sm:$0xff] }
 0x180   : > { %1580 = vmatpush.msrb.mxu2 %v933_v53  ;;  %1552 = vmatpush.msrb.mxu0 %v1092_v54  ;;  %v1149_v27 = vld [vmem:[%s2914_s24 + $0xa98] sm:$0xff] }
 0x181   : > { %1575 = vmatpush.msrb.mxu1 %v1196_v55  ;;  %1604 = vmatpush.msrb.mxu3 %v1029_v56  ;;  %v1253_v28 = vld [vmem:[%s2914_s24 + $0xdd8] sm:$0xff]  ;;  %v1038_v56 = vld [vmem:[%s2914_s24 + $0x720] sm:$0xff] }
 0x182   : > { %1576 = vmatmul.f32.vlgmr.msrb.gmra.mxu1 %v3062_v50  ;;  %1581 = vmatpush.msrb.mxu2 %v925_v57  ;;  %v853_v29 = vld [vmem:[%s2914_s24 + $0x158] sm:$0xff]  ;;  %v934_v57 = vld [vmem:[%s2914_s24 + $0x3e0] sm:$0xff] }
 0x183   : > { %1640 = vmatpush.msra.mxu1 %v1317_v58  ;;  %1553 = vmatpush.msrb.mxu0 %v1084_v59  ;;  %v957_v30 = vld [vmem:[%s2914_s24 + $0x498] sm:$0xff] }
 0x184   : > { %1582 = vmatpush.msrb.mxu2 %v917_v60  ;;  %1605 = vmatpush.msrb.mxu3 %v1021_v61  ;;  %v1141_v31 = vld [vmem:[%s2914_s24 + $0xa58] sm:$0xff]  ;;  %v1030_v60 = vld [vmem:[%s2914_s24 + $0x6e0] sm:$0xff] }
 0x185   : > { %1641 = vmatpush.msra.mxu1 %v1309_v62  ;;  %1554 = vmatpush.msrb.mxu0 %v1076_v0  ;;  %v1245_v32 = vld [vmem:[%s2914_s24 + $0xd98] sm:$0xff]  ;;  %v926_v61 = vld [vmem:[%s2914_s24 + $0x3a0] sm:$0xff] }
 0x186   : > { %1583 = vmatpush.msrb.mxu2 %v909_v1  ;;  %1606 = vmatpush.msrb.mxu3 %v1013_v2  ;;  %v845_v34 = vld [vmem:[%s2914_s24 + $0x118] sm:$0xff]  ;;  %v1318_v62 = vld [vmem:[%s2914_s24 + $0xfe0] sm:$0xff] }
 0x187   : > { %1642 = vmatpush.msra.mxu1 %v1301_v3  ;;  %1555 = vmatpush.msrb.mxu0 %v1068_v4  ;;  %v949_v35 = vld [vmem:[%s2914_s24 + $0x458] sm:$0xff]  ;;  %v918_v1 = vld [vmem:[%s2914_s24 + $0x360] sm:$0xff] }
 0x188   : > { %1556 = vmatmul.f32.vlgmr.msrb.gmra.mxu0 %v3074_v63  ;;  %1584 = vmatpush.msrb.mxu2 %v901_v5  ;;  %v1133_v36 = vld [vmem:[%s2914_s24 + $0xa18] sm:$0xff]  ;;  %v1022_v2 = vld [vmem:[%s2914_s24 + $0x6a0] sm:$0xff] }
 0x189   : > { %1607 = vmatpush.msrb.mxu3 %v1005_v6  ;;  %1620 = vmatpush.msra.mxu0 %v1189_v7  ;;  %v1237_v37 = vld [vmem:[%s2914_s24 + $0xd58] sm:$0xff]  ;;  %v1310_v3 = vld [vmem:[%s2914_s24 + $0xfa0] sm:$0xff] }
 0x18a   : > { %1643 = vmatpush.msra.mxu1 %v1293_v8  ;;  %1585 = vmatpush.msrb.mxu2 %v893_v9  ;;  %v837_v38 = vld [vmem:[%s2914_s24 + $0xd8] sm:$0xff]  ;;  %v910_v5 = vld [vmem:[%s2914_s24 + $0x320] sm:$0xff] }
 0x18b   : > { %1608 = vmatpush.msrb.mxu3 %v997_v10  ;;  %1621 = vmatpush.msra.mxu0 %v1181_v11  ;;  %v941_v39 = vld [vmem:[%s2914_s24 + $0x418] sm:$0xff]  ;;  %v1014_v6 = vld [vmem:[%s2914_s24 + $0x660] sm:$0xff] }
 0x18c   : > { %1644 = vmatpush.msra.mxu1 %v1285_v12  ;;  %1586 = vmatpush.msrb.mxu2 %v885_v13  ;;  %v1125_v40 = vld [vmem:[%s2914_s24 + $0x9d8] sm:$0xff]  ;;  %v1302_v7 = vld [vmem:[%s2914_s24 + $0xf60] sm:$0xff] }
 0x18d   : > { %1609 = vmatpush.msrb.mxu3 %v989_v14  ;;  %1622 = vmatpush.msra.mxu0 %v1173_v15  ;;  %v1229_v41 = vld [vmem:[%s2914_s24 + $0xd18] sm:$0xff]  ;;  %v902_v9 = vld [vmem:[%s2914_s24 + $0x2e0] sm:$0xff] }
 0x18e   : > { %1645 = vmatpush.msra.mxu1 %v1277_v16  ;;  %1587 = vmatpush.msrb.mxu2 %v877_v17  ;;  %v829_v43 = vld [vmem:[%s2914_s24 + $0x98] sm:$0xff]  ;;  %v1006_v10 = vld [vmem:[%s2914_s24 + $0x620] sm:$0xff] }
 0x18f   : > { %1610 = vmatpush.msrb.mxu3 %v981_v18  ;;  %1623 = vmatpush.msra.mxu0 %v1165_v19  ;;  %v1117_v45 = vld [vmem:[%s2914_s24 + $0x998] sm:$0xff]  ;;  %v1190_v11 = vld [vmem:[%s2914_s24 + $0xbe0] sm:$0xff] }
 0x190   : > { %1646 = vmatpush.msra.mxu1 %v1269_v20  ;;  %1588 = vmatpush.msrb.mxu2 %v869_v21  ;;  %v1221_v46 = vld [vmem:[%s2914_s24 + $0xcd8] sm:$0xff]  ;;  %v1294_v12 = vld [vmem:[%s2914_s24 + $0xf20] sm:$0xff] }
 0x191   : > { %1611 = vmatpush.msrb.mxu3 %v973_v22  ;;  %1624 = vmatpush.msra.mxu0 %v1157_v23  ;;  %v821_v48 = vld [vmem:[%s2914_s24 + $0x58] sm:$0xff]  ;;  %v894_v13 = vld [vmem:[%s2914_s24 + $0x2a0] sm:$0xff] }
 0x192   : > { %1647 = vmatpush.msra.mxu1 %v1261_v24  ;;  %1589 = vmatpush.msrb.mxu2 %v861_v25  ;;  %v1109_v49 = vld [vmem:[%s2914_s24 + $0x958] sm:$0xff]  ;;  %v998_v14 = vld [vmem:[%s2914_s24 + $0x5e0] sm:$0xff] }
 0x193   : > { %1612 = vmatpush.msrb.mxu3 %v965_v26  ;;  %1625 = vmatpush.msra.mxu0 %v1149_v27  ;;  %v1213_v51 = vld [vmem:[%s2914_s24 + $0xc98] sm:$0xff]  ;;  %v1182_v15 = vld [vmem:[%s2914_s24 + $0xba0] sm:$0xff] }
 0x194   : > { %1648 = vmatpush.msra.mxu1 %v1253_v28  ;;  %1590 = vmatpush.msrb.mxu2 %v853_v29  ;;  %v813_v53 = vld [vmem:[%s2914_s24 + $0x18] sm:$0xff]  ;;  %v1286_v16 = vld [vmem:[%s2914_s24 + $0xee0] sm:$0xff] }
 0x195   : > { %1613 = vmatpush.msrb.mxu3 %v957_v30  ;;  %1626 = vmatpush.msra.mxu0 %v1141_v31  ;;  %v1101_v54 = vld [vmem:[%s2914_s24 + $0x918] sm:$0xff]  ;;  %v886_v17 = vld [vmem:[%s2914_s24 + $0x260] sm:$0xff] }
 0x196   : > { %1649 = vmatpush.msra.mxu1 %v1245_v32  ;;  %1591 = vmatpush.msrb.mxu2 %v845_v34  ;;  %v1205_v55 = vld [vmem:[%s2914_s24 + $0xc58] sm:$0xff]  ;;  %v990_v18 = vld [vmem:[%s2914_s24 + $0x5a0] sm:$0xff] }
 0x197   : > { %1614 = vmatpush.msrb.mxu3 %v949_v35  ;;  %1627 = vmatpush.msra.mxu0 %v1133_v36  ;;  %v1093_v58 = vld [vmem:[%s2914_s24 + $0x8d8] sm:$0xff]  ;;  %v1174_v19 = vld [vmem:[%s2914_s24 + $0xb60] sm:$0xff] }
 0x198   : > { %1650 = vmatpush.msra.mxu1 %v1237_v37  ;;  %1592 = vmatpush.msrb.mxu2 %v837_v38  ;;  %v1197_v59 = vld [vmem:[%s2914_s24 + $0xc18] sm:$0xff]  ;;  %v1278_v20 = vld [vmem:[%s2914_s24 + $0xea0] sm:$0xff] }
 0x199   : > { %1615 = vmatpush.msrb.mxu3 %v941_v39  ;;  %1628 = vmatpush.msra.mxu0 %v1125_v40  ;;  %v1085_v0 = vld [vmem:[%s2914_s24 + $0x898] sm:$0xff]  ;;  %v878_v21 = vld [vmem:[%s2914_s24 + $0x220] sm:$0xff] }
 0x19a   : > { %1651 = vmatpush.msra.mxu1 %v1229_v41  ;;  %1616 = vmatmul.f32.vlgmr.msrb.gmra.mxu3 %v3051_v33  ;;  %v1077_v4 = vld [vmem:[%s2914_s24 + $0x858] sm:$0xff]  ;;  %v982_v22 = vld [vmem:[%s2914_s24 + $0x560] sm:$0xff] }
 0x19b   : > { %1680 = vmatpush.msra.mxu3 %v1062_v42  ;;  %1593 = vmatpush.msrb.mxu2 %v829_v43  ;;  %v1069_v8 = vld [vmem:[%s2914_s24 + $0x818] sm:$0xff]  ;;  %v1166_v23 = vld [vmem:[%s2914_s24 + $0xb20] sm:$0xff] }
 0x19c   : > { %1629 = vmatpush.msra.mxu0 %v1117_v45  ;;  %1652 = vmatpush.msra.mxu1 %v1221_v46  ;;  %v1270_v24 = vld [vmem:[%s2914_s24 + $0xe60] sm:$0xff] }
 0x19d   : > { %1681 = vmatpush.msra.mxu3 %v1054_v47  ;;  %1594 = vmatpush.msrb.mxu2 %v821_v48  ;;  %v870_v25 = vld [vmem:[%s2914_s24 + $0x1e0] sm:$0xff]  ;;  %v1063_v47 = vld [vmem:[%s2914_s24 + $0x7e8] sm:$0xff] }
 0x19e   : > { %1630 = vmatpush.msra.mxu0 %v1109_v49  ;;  %1653 = vmatpush.msra.mxu1 %v1213_v51  ;;  %v974_v26 = vld [vmem:[%s2914_s24 + $0x520] sm:$0xff] }
 0x19f   : > { %1682 = vmatpush.msra.mxu3 %v1046_v52  ;;  %1595 = vmatpush.msrb.mxu2 %v813_v53  ;;  %v1158_v27 = vld [vmem:[%s2914_s24 + $0xae0] sm:$0xff]  ;;  %v1055_v52 = vld [vmem:[%s2914_s24 + $0x7a8] sm:$0xff] }
 0x1a0   : > { %1631 = vmatpush.msra.mxu0 %v1101_v54  ;;  %1654 = vmatpush.msra.mxu1 %v1205_v55  ;;  %v1262_v28 = vld [vmem:[%s2914_s24 + $0xe20] sm:$0xff] }
 0x1a1   : > { %1596 = vmatmul.f32.vlgmr.msrb.gmra.mxu2 %v3057_v44  ;;  %1683 = vmatpush.msra.mxu3 %v1038_v56  ;;  %v862_v29 = vld [vmem:[%s2914_s24 + $0x1a0] sm:$0xff]  ;;  %v1047_v56 = vld [vmem:[%s2914_s24 + $0x768] sm:$0xff] }
 0x1a2   : > { %1660 = vmatpush.msra.mxu2 %v934_v57  ;;  %1632 = vmatpush.msra.mxu0 %v1093_v58  ;;  %v966_v30 = vld [vmem:[%s2914_s24 + $0x4e0] sm:$0xff] }
 0x1a3   : > { %1655 = vmatpush.msra.mxu1 %v1197_v59  ;;  %1684 = vmatpush.msra.mxu3 %v1030_v60  ;;  %v1150_v31 = vld [vmem:[%s2914_s24 + $0xaa0] sm:$0xff]  ;;  %v1039_v60 = vld [vmem:[%s2914_s24 + $0x728] sm:$0xff] }
 0x1a4   : > { %1656 = vmatmul.f32.vlgmr.msra.gmra.mxu1 %v3062_v50  ;;  %1661 = vmatpush.msra.mxu2 %v926_v61  ;;  %v1254_v32 = vld [vmem:[%s2914_s24 + $0xde0] sm:$0xff]  ;;  %v935_v61 = vld [vmem:[%s2914_s24 + $0x3e8] sm:$0xff] }
 0x1a5   : > { %1720 = vmatpush.msrb.mxu1 %v1318_v62  ;;  %1633 = vmatpush.msra.mxu0 %v1085_v0  ;;  %v854_v34 = vld [vmem:[%s2914_s24 + $0x160] sm:$0xff] }
 0x1a6   : > { %1662 = vmatpush.msra.mxu2 %v918_v1  ;;  %1685 = vmatpush.msra.mxu3 %v1022_v2  ;;  %v958_v35 = vld [vmem:[%s2914_s24 + $0x4a0] sm:$0xff]  ;;  %v1031_v1 = vld [vmem:[%s2914_s24 + $0x6e8] sm:$0xff] }
 0x1a7   : > { %1721 = vmatpush.msrb.mxu1 %v1310_v3  ;;  %1634 = vmatpush.msra.mxu0 %v1077_v4  ;;  %v1142_v36 = vld [vmem:[%s2914_s24 + $0xa60] sm:$0xff]  ;;  %v927_v2 = vld [vmem:[%s2914_s24 + $0x3a8] sm:$0xff] }
 0x1a8   : > { %1663 = vmatpush.msra.mxu2 %v910_v5  ;;  %1686 = vmatpush.msra.mxu3 %v1014_v6  ;;  %v1246_v37 = vld [vmem:[%s2914_s24 + $0xda0] sm:$0xff]  ;;  %v1319_v3 = vld [vmem:[%s2914_s24 + $0xfe8] sm:$0xff] }
 0x1a9   : > { %1722 = vmatpush.msrb.mxu1 %v1302_v7  ;;  %1635 = vmatpush.msra.mxu0 %v1069_v8  ;;  %v846_v38 = vld [vmem:[%s2914_s24 + $0x120] sm:$0xff]  ;;  %v919_v5 = vld [vmem:[%s2914_s24 + $0x368] sm:$0xff] }
 0x1aa   : > { %1636 = vmatmul.f32.vlgmr.msra.gmra.mxu0 %v3074_v63  ;;  %1664 = vmatpush.msra.mxu2 %v902_v9  ;;  %v950_v39 = vld [vmem:[%s2914_s24 + $0x460] sm:$0xff]  ;;  %v1023_v6 = vld [vmem:[%s2914_s24 + $0x6a8] sm:$0xff] }
 0x1ab   : > { %1687 = vmatpush.msra.mxu3 %v1006_v10  ;;  %1700 = vmatpush.msrb.mxu0 %v1190_v11  ;;  %v1134_v40 = vld [vmem:[%s2914_s24 + $0xa20] sm:$0xff]  ;;  %v1311_v7 = vld [vmem:[%s2914_s24 + $0xfa8] sm:$0xff] }
 0x1ac   : > { %1723 = vmatpush.msrb.mxu1 %v1294_v12  ;;  %1665 = vmatpush.msra.mxu2 %v894_v13  ;;  %v1238_v41 = vld [vmem:[%s2914_s24 + $0xd60] sm:$0xff]  ;;  %v911_v9 = vld [vmem:[%s2914_s24 + $0x328] sm:$0xff] }
 0x1ad   : > { %1688 = vmatpush.msra.mxu3 %v998_v14  ;;  %1701 = vmatpush.msrb.mxu0 %v1182_v15  ;;  %v838_v42 = vld [vmem:[%s2914_s24 + $0xe0] sm:$0xff]  ;;  %v1015_v10 = vld [vmem:[%s2914_s24 + $0x668] sm:$0xff] }
 0x1ae   : > { %1724 = vmatpush.msrb.mxu1 %v1286_v16  ;;  %1666 = vmatpush.msra.mxu2 %v886_v17  ;;  %v942_v43 = vld [vmem:[%s2914_s24 + $0x420] sm:$0xff]  ;;  %v1303_v11 = vld [vmem:[%s2914_s24 + $0xf68] sm:$0xff] }
 0x1af   : > { %1689 = vmatpush.msra.mxu3 %v990_v18  ;;  %1702 = vmatpush.msrb.mxu0 %v1174_v19  ;;  %v1126_v45 = vld [vmem:[%s2914_s24 + $0x9e0] sm:$0xff]  ;;  %v903_v13 = vld [vmem:[%s2914_s24 + $0x2e8] sm:$0xff] }
 0x1b0   : > { %1725 = vmatpush.msrb.mxu1 %v1278_v20  ;;  %1667 = vmatpush.msra.mxu2 %v878_v21  ;;  %v1230_v46 = vld [vmem:[%s2914_s24 + $0xd20] sm:$0xff]  ;;  %v1007_v14 = vld [vmem:[%s2914_s24 + $0x628] sm:$0xff] }
 0x1b1   : > { %1690 = vmatpush.msra.mxu3 %v982_v22  ;;  %1703 = vmatpush.msrb.mxu0 %v1166_v23  ;;  %v830_v48 = vld [vmem:[%s2914_s24 + $0xa0] sm:$0xff]  ;;  %v1191_v15 = vld [vmem:[%s2914_s24 + $0xbe8] sm:$0xff] }
 0x1b2   : > { %1726 = vmatpush.msrb.mxu1 %v1270_v24  ;;  %1668 = vmatpush.msra.mxu2 %v870_v25  ;;  %v1118_v49 = vld [vmem:[%s2914_s24 + $0x9a0] sm:$0xff]  ;;  %v1295_v16 = vld [vmem:[%s2914_s24 + $0xf28] sm:$0xff] }
 0x1b3   : > { %1691 = vmatpush.msra.mxu3 %v974_v26  ;;  %1704 = vmatpush.msrb.mxu0 %v1158_v27  ;;  %v1222_v51 = vld [vmem:[%s2914_s24 + $0xce0] sm:$0xff]  ;;  %v895_v17 = vld [vmem:[%s2914_s24 + $0x2a8] sm:$0xff] }
 0x1b4   : > { %1727 = vmatpush.msrb.mxu1 %v1262_v28  ;;  %1669 = vmatpush.msra.mxu2 %v862_v29  ;;  %v822_v53 = vld [vmem:[%s2914_s24 + $0x60] sm:$0xff]  ;;  %v999_v18 = vld [vmem:[%s2914_s24 + $0x5e8] sm:$0xff] }
 0x1b5   : > { %1692 = vmatpush.msra.mxu3 %v966_v30  ;;  %1705 = vmatpush.msrb.mxu0 %v1150_v31  ;;  %v1110_v54 = vld [vmem:[%s2914_s24 + $0x960] sm:$0xff]  ;;  %v1183_v19 = vld [vmem:[%s2914_s24 + $0xba8] sm:$0xff] }
 0x1b6   : > { %1728 = vmatpush.msrb.mxu1 %v1254_v32  ;;  %1670 = vmatpush.msra.mxu2 %v854_v34  ;;  %v1214_v55 = vld [vmem:[%s2914_s24 + $0xca0] sm:$0xff]  ;;  %v1287_v20 = vld [vmem:[%s2914_s24 + $0xee8] sm:$0xff] }
 0x1b7   : > { %1693 = vmatpush.msra.mxu3 %v958_v35  ;;  %1706 = vmatpush.msrb.mxu0 %v1142_v36  ;;  %v814_v57 = vld [vmem:[%s2914_s24 + $0x20] sm:$0xff]  ;;  %v887_v21 = vld [vmem:[%s2914_s24 + $0x268] sm:$0xff] }
 0x1b8   : > { %1729 = vmatpush.msrb.mxu1 %v1246_v37  ;;  %1671 = vmatpush.msra.mxu2 %v846_v38  ;;  %v1102_v58 = vld [vmem:[%s2914_s24 + $0x920] sm:$0xff]  ;;  %v991_v22 = vld [vmem:[%s2914_s24 + $0x5a8] sm:$0xff] }
 0x1b9   : > { %1694 = vmatpush.msra.mxu3 %v950_v39  ;;  %1707 = vmatpush.msrb.mxu0 %v1134_v40  ;;  %v1206_v59 = vld [vmem:[%s2914_s24 + $0xc60] sm:$0xff]  ;;  %v1175_v23 = vld [vmem:[%s2914_s24 + $0xb68] sm:$0xff] }
 0x1ba   : > { %1730 = vmatpush.msrb.mxu1 %v1238_v41  ;;  %1672 = vmatpush.msra.mxu2 %v838_v42  ;;  %v1094_v62 = vld [vmem:[%s2914_s24 + $0x8e0] sm:$0xff]  ;;  %v1279_v24 = vld [vmem:[%s2914_s24 + $0xea8] sm:$0xff] }
 0x1bb   : > { %1695 = vmatpush.msra.mxu3 %v942_v43  ;;  %1708 = vmatpush.msrb.mxu0 %v1126_v45  ;;  %v1198_v0 = vld [vmem:[%s2914_s24 + $0xc20] sm:$0xff]  ;;  %v879_v25 = vld [vmem:[%s2914_s24 + $0x228] sm:$0xff] }
 0x1bc   : > { %1731 = vmatpush.msrb.mxu1 %v1230_v46  ;;  %1696 = vmatmul.f32.vlgmr.msra.gmra.mxu3 %v3051_v33  ;;  %v1086_v4 = vld [vmem:[%s2914_s24 + $0x8a0] sm:$0xff]  ;;  %v983_v26 = vld [vmem:[%s2914_s24 + $0x568] sm:$0xff] }
 0x1bd   : > { %1760 = vmatpush.msrb.mxu3 %v1063_v47  ;;  %1673 = vmatpush.msra.mxu2 %v830_v48  ;;  %v1078_v8 = vld [vmem:[%s2914_s24 + $0x860] sm:$0xff]  ;;  %v1167_v27 = vld [vmem:[%s2914_s24 + $0xb28] sm:$0xff] }
 0x1be   : > { %1709 = vmatpush.msrb.mxu0 %v1118_v49  ;;  %1732 = vmatpush.msrb.mxu1 %v1222_v51  ;;  %v1070_v12 = vld [vmem:[%s2914_s24 + $0x820] sm:$0xff]  ;;  %v1271_v28 = vld [vmem:[%s2914_s24 + $0xe68] sm:$0xff] }
 0x1bf   : > { %1761 = vmatpush.msrb.mxu3 %v1055_v52  ;;  %1674 = vmatpush.msra.mxu2 %v822_v53  ;;  %v871_v29 = vld [vmem:[%s2914_s24 + $0x1e8] sm:$0xff] }
 0x1c0   : > { %1710 = vmatpush.msrb.mxu0 %v1110_v54  ;;  %1733 = vmatpush.msrb.mxu1 %v1214_v55  ;;  %v975_v30 = vld [vmem:[%s2914_s24 + $0x528] sm:$0xff]  ;;  %v1064_v54 = vld [vmem:[%s2914_s24 + $0x7f0] sm:$0xff] }
 0x1c1   : > { %1762 = vmatpush.msrb.mxu3 %v1047_v56  ;;  %1675 = vmatpush.msra.mxu2 %v814_v57  ;;  %v1159_v31 = vld [vmem:[%s2914_s24 + $0xae8] sm:$0xff] }
 0x1c2   : > { %1711 = vmatpush.msrb.mxu0 %v1102_v58  ;;  %1734 = vmatpush.msrb.mxu1 %v1206_v59  ;;  %v1263_v32 = vld [vmem:[%s2914_s24 + $0xe28] sm:$0xff]  ;;  %v1056_v58 = vld [vmem:[%s2914_s24 + $0x7b0] sm:$0xff] }
 0x1c3   : > { %1676 = vmatmul.f32.vlgmr.msra.gmra.mxu2 %v3057_v44  ;;  %1763 = vmatpush.msrb.mxu3 %v1039_v60  ;;  %v863_v34 = vld [vmem:[%s2914_s24 + $0x1a8] sm:$0xff] }
 0x1c4   : > { %1740 = vmatpush.msrb.mxu2 %v935_v61  ;;  %1712 = vmatpush.msrb.mxu0 %v1094_v62  ;;  %v967_v35 = vld [vmem:[%s2914_s24 + $0x4e8] sm:$0xff] }
 0x1c5   : > { %1735 = vmatpush.msrb.mxu1 %v1198_v0  ;;  %1764 = vmatpush.msrb.mxu3 %v1031_v1  ;;  %v1151_v36 = vld [vmem:[%s2914_s24 + $0xaa8] sm:$0xff]  ;;  %v1048_v1 = vld [vmem:[%s2914_s24 + $0x770] sm:$0xff] }
 0x1c6   : > { %1736 = vmatmul.f32.vlgmr.msrb.gmra.mxu1 %v3062_v50  ;;  %1741 = vmatpush.msrb.mxu2 %v927_v2  ;;  %v1255_v37 = vld [vmem:[%s2914_s24 + $0xde8] sm:$0xff] }
 0x1c7   : > { %1800 = vmatpush.msra.mxu1 %v1319_v3  ;;  %1713 = vmatpush.msrb.mxu0 %v1086_v4  ;;  %v855_v38 = vld [vmem:[%s2914_s24 + $0x168] sm:$0xff] }
 0x1c8   : > { %1742 = vmatpush.msrb.mxu2 %v919_v5  ;;  %1765 = vmatpush.msrb.mxu3 %v1023_v6  ;;  %v959_v39 = vld [vmem:[%s2914_s24 + $0x4a8] sm:$0xff] }
 0x1c9   : > { %1801 = vmatpush.msra.mxu1 %v1311_v7  ;;  %1714 = vmatpush.msrb.mxu0 %v1078_v8  ;;  %v1143_v40 = vld [vmem:[%s2914_s24 + $0xa68] sm:$0xff]  ;;  %v1040_v7 = vld [vmem:[%s2914_s24 + $0x730] sm:$0xff] }
 0x1ca   : > { %1743 = vmatpush.msrb.mxu2 %v911_v9  ;;  %1766 = vmatpush.msrb.mxu3 %v1015_v10  ;;  %v1247_v41 = vld [vmem:[%s2914_s24 + $0xda8] sm:$0xff]  ;;  %v936_v9 = vld [vmem:[%s2914_s24 + $0x3f0] sm:$0xff] }
 0x1cb   : > { %1802 = vmatpush.msra.mxu1 %v1303_v11  ;;  %1715 = vmatpush.msrb.mxu0 %v1070_v12  ;;  %v847_v42 = vld [vmem:[%s2914_s24 + $0x128] sm:$0xff] }
 0x1cc   : > { %1716 = vmatmul.f32.vlgmr.msrb.gmra.mxu0 %v3074_v63  ;;  %1744 = vmatpush.msrb.mxu2 %v903_v13  ;;  %v951_v43 = vld [vmem:[%s2914_s24 + $0x468] sm:$0xff]  ;;  %v1032_v13 = vld [vmem:[%s2914_s24 + $0x6f0] sm:$0xff] }
 0x1cd   : > { %1767 = vmatpush.msrb.mxu3 %v1007_v14  ;;  %1780 = vmatpush.msra.mxu0 %v1191_v15  ;;  %v1135_v45 = vld [vmem:[%s2914_s24 + $0xa28] sm:$0xff]  ;;  %v928_v15 = vld [vmem:[%s2914_s24 + $0x3b0] sm:$0xff] }
 0x1ce   : > { %1803 = vmatpush.msra.mxu1 %v1295_v16  ;;  %1745 = vmatpush.msrb.mxu2 %v895_v17  ;;  %v3318_v46 = vld [vmem:[%s378_s22] sm:$0xff] }
 0x1cf   : > { %1768 = vmatpush.msrb.mxu3 %v999_v18  ;;  %1781 = vmatpush.msra.mxu0 %v1183_v19  ;;  %v1239_v47 = vld [vmem:[%s2914_s24 + $0xd68] sm:$0xff]  ;;  %v1324_v53 = vperm.slane %v3318_v46, 0  ;;  %v1325_v17 = vperm.slane %v3318_v46, 1  ;;  %v1320_v18 = vld [vmem:[%s2914_s24 + $0xff0] sm:$0xff] }
 0x1d0   : > { %1804 = vmatpush.msra.mxu1 %v1287_v20  ;;  %1746 = vmatpush.msrb.mxu2 %v887_v21  ;;  %v839_v48 = vld [vmem:[%s2914_s24 + $0xe8] sm:$0xff]  ;;  %v920_v20 = vld [vmem:[%s2914_s24 + $0x370] sm:$0xff] }
 0x1d1   : > { %1769 = vmatpush.msrb.mxu3 %v991_v22  ;;  %1782 = vmatpush.msra.mxu0 %v1175_v23  ;;  %v943_v49 = vld [vmem:[%s2914_s24 + $0x428] sm:$0xff]  ;;  %v1024_v21 = vld [vmem:[%s2914_s24 + $0x6b0] sm:$0xff] }
 0x1d2   : > { %1805 = vmatpush.msra.mxu1 %v1279_v24  ;;  %1747 = vmatpush.msrb.mxu2 %v879_v25  ;;  %v1127_v51 = vld [vmem:[%s2914_s24 + $0x9e8] sm:$0xff]  ;;  %v1312_v23 = vld [vmem:[%s2914_s24 + $0xfb0] sm:$0xff] }
 0x1d3   : > { %1770 = vmatpush.msrb.mxu3 %v983_v26  ;;  %1783 = vmatpush.msra.mxu0 %v1167_v27  ;;  %v1231_v52 = vld [vmem:[%s2914_s24 + $0xd28] sm:$0xff]  ;;  %v912_v26 = vld [vmem:[%s2914_s24 + $0x330] sm:$0xff] }
 0x1d4   : > { %1806 = vmatpush.msra.mxu1 %v1271_v28  ;;  %1748 = vmatpush.msrb.mxu2 %v871_v29  ;;  %v831_v55 = vld [vmem:[%s2914_s24 + $0xa8] sm:$0xff]  ;;  %v1016_v27 = vld [vmem:[%s2914_s24 + $0x670] sm:$0xff] }
 0x1d5   : > { %1771 = vmatpush.msrb.mxu3 %v975_v30  ;;  %1784 = vmatpush.msra.mxu0 %v1159_v31  ;;  %v1119_v56 = vld [vmem:[%s2914_s24 + $0x9a8] sm:$0xff]  ;;  %v1304_v29 = vld [vmem:[%s2914_s24 + $0xf70] sm:$0xff] }
 0x1d6   : > { %1807 = vmatpush.msra.mxu1 %v1263_v32  ;;  %1749 = vmatpush.msrb.mxu2 %v863_v34  ;;  %v1223_v57 = vld [vmem:[%s2914_s24 + $0xce8] sm:$0xff]  ;;  %v904_v32 = vld [vmem:[%s2914_s24 + $0x2f0] sm:$0xff] }
 0x1d7   : > { %1772 = vmatpush.msrb.mxu3 %v967_v35  ;;  %1785 = vmatpush.msra.mxu0 %v1151_v36  ;;  %v823_v59 = vld [vmem:[%s2914_s24 + $0x68] sm:$0xff]  ;;  %v1008_v35 = vld [vmem:[%s2914_s24 + $0x630] sm:$0xff] }
 0x1d8   : > { %1808 = vmatpush.msra.mxu1 %v1255_v37  ;;  %1750 = vmatpush.msrb.mxu2 %v855_v38  ;;  %v1111_v61 = vld [vmem:[%s2914_s24 + $0x968] sm:$0xff]  ;;  %v1192_v36 = vld [vmem:[%s2914_s24 + $0xbf0] sm:$0xff] }
 0x1d9   : > { %1773 = vmatpush.msrb.mxu3 %v959_v39  ;;  %1786 = vmatpush.msra.mxu0 %v1143_v40  ;;  %v1215_v62 = vld [vmem:[%s2914_s24 + $0xca8] sm:$0xff]  ;;  %v1377_v3 = vpop.f32.mrf.mxu3  ;;  %v1296_v38 = vld [vmem:[%s2914_s24 + $0xf30] sm:$0xff] }
 0x1da   : > { %1809 = vmatpush.msra.mxu1 %v1247_v41  ;;  %1751 = vmatpush.msrb.mxu2 %v847_v42  ;;  %v815_v2 = vld [vmem:[%s2914_s24 + $0x28] sm:$0xff]  ;;  %v896_v39 = vld [vmem:[%s2914_s24 + $0x2b0] sm:$0xff] }
 0x1db   : > { %1774 = vmatpush.msrb.mxu3 %v951_v43  ;;  %1787 = vmatpush.msra.mxu0 %v1135_v45  ;;  %v1103_v4 = vld [vmem:[%s2914_s24 + $0x928] sm:$0xff]  ;;  %v1417_v14 = vpop.f32.mrf.mxu1  ;;  %v1000_v41 = vld [vmem:[%s2914_s24 + $0x5f0] sm:$0xff] }
 0x1dc   : > { %1810 = vmatpush.msra.mxu1 %v1239_v47  ;;  %1752 = vmatpush.msrb.mxu2 %v839_v48  ;;  %v1207_v5 = vld [vmem:[%s2914_s24 + $0xc68] sm:$0xff]  ;;  %v1184_v42 = vld [vmem:[%s2914_s24 + $0xbb0] sm:$0xff] }
 0x1dd   : > { %1775 = vmatpush.msrb.mxu3 %v943_v49  ;;  %1788 = vmatpush.msra.mxu0 %v1127_v51  ;;  %v1095_v10 = vld [vmem:[%s2914_s24 + $0x8e8] sm:$0xff]  ;;  %v1288_v47 = vld [vmem:[%s2914_s24 + $0xef0] sm:$0xff] }
 0x1de   : > { %1811 = vmatpush.msra.mxu1 %v1231_v52  ;;  %1776 = vmatmul.f32.vlgmr.msrb.gmra.mxu3 %v3051_v33  ;;  %v1357_v60 = vpop.f32.mrf.mxu2  ;;  %v1199_v12 = vld [vmem:[%s2914_s24 + $0xc28] sm:$0xff]  ;;  %v888_v48 = vld [vmem:[%s2914_s24 + $0x270] sm:$0xff] }
 0x1df   : > { %1840 = vmatpush.msra.mxu3 %v1064_v54  ;;  %1753 = vmatpush.msrb.mxu2 %v831_v55  ;;  %v1358_v0 = vadd.f32 %v1357_v60, %v1324_v53  ;;  %v1087_v19 = vld [vmem:[%s2914_s24 + $0x8a8] sm:$0xff]  ;;  %v992_v52 = vld [vmem:[%s2914_s24 + $0x5b0] sm:$0xff] }
 0x1e0   : > { %1789 = vmatpush.msra.mxu0 %v1119_v56  ;;  %1812 = vmatpush.msra.mxu1 %v1223_v57  ;;  %v1079_v24 = vld [vmem:[%s2914_s24 + $0x868] sm:$0xff]  ;;  %v1176_v53 = vld [vmem:[%s2914_s24 + $0xb70] sm:$0xff] }
 0x1e1   : > { %1841 = vmatpush.msra.mxu3 %v1056_v58  ;;  %1754 = vmatpush.msrb.mxu2 %v823_v59  ;;  %v1378_v6 = vadd.f32 %v1377_v3, %v1358_v0  ;;  %v1397_v8 = vpop.f32.mrf.mxu0  ;;  %v1071_v30 = vld [vmem:[%s2914_s24 + $0x828] sm:$0xff]  ;;  %v1457_v31 = vpop.f32.mrf.mxu3  ;;  %v1280_v54 = vld [vmem:[%s2914_s24 + $0xeb0] sm:$0xff] }
 0x1e2   : > { %1790 = vmatpush.msra.mxu0 %v1111_v61  ;;  %1813 = vmatpush.msra.mxu1 %v1215_v62  ;;  %v880_v55 = vld [vmem:[%s2914_s24 + $0x230] sm:$0xff] }
 0x1e3   : > { %1842 = vmatpush.msra.mxu3 %v1048_v1  ;;  %1755 = vmatpush.msrb.mxu2 %v815_v2  ;;  %v1398_v11 = vadd.f32 %v1397_v8, %v1378_v6  ;;  %v984_v57 = vld [vmem:[%s2914_s24 + $0x570] sm:$0xff] }
 0x1e4   : > { %1791 = vmatpush.msra.mxu0 %v1103_v4  ;;  %1814 = vmatpush.msra.mxu1 %v1207_v5  ;;  %v1168_v58 = vld [vmem:[%s2914_s24 + $0xb30] sm:$0xff] }
 0x1e5   : > { %1756 = vmatmul.f32.vlgmr.msrb.gmra.mxu2 %v3057_v44  ;;  %1843 = vmatpush.msra.mxu3 %v1040_v7  ;;  %v1418_v16 = vadd.f32 %v1417_v14, %v1398_v11  ;;  %v1497_v43 = vpop.f32.mrf.mxu1  ;;  %v1272_v59 = vld [vmem:[%s2914_s24 + $0xe70] sm:$0xff] }
 0x1e6   : > { %1820 = vmatpush.msra.mxu2 %v936_v9  ;;  %1792 = vmatpush.msra.mxu0 %v1095_v10  ;;  %v872_v60 = vld [vmem:[%s2914_s24 + $0x1f0] sm:$0xff] }
 0x1e7   : > { %1815 = vmatpush.msra.mxu1 %v1199_v12  ;;  %1844 = vmatpush.msra.mxu3 %v1032_v13  ;;  %v2330_v22 = vmul.f32 -1.442695, %v1418_v16  ;;  %v976_v61 = vld [vmem:[%s2914_s24 + $0x530] sm:$0xff] }
 0x1e8   : > { %1816 = vmatmul.f32.vlgmr.msra.gmra.mxu1 %v3062_v50  ;;  %1821 = vmatpush.msra.mxu2 %v928_v15  ;;  %v1437_v25 = vpop.f32.mrf.mxu2  ;;  %v1160_v62 = vld [vmem:[%s2914_s24 + $0xaf0] sm:$0xff] }
 0x1e9   : > { %1880 = vmatpush.msrb.mxu1 %v1320_v18  ;;  %1793 = vmatpush.msra.mxu0 %v1087_v19  ;;  %2449 = vpow2.f32 %v2330_v22  ;;  %v1438_v28 = vadd.f32 %v1437_v25, %v1325_v17  ;;  %v1264_v0 = vld [vmem:[%s2914_s24 + $0xe30] sm:$0xff]  ;;  %v1065_v25 = vld [vmem:[%s2914_s24 + $0x7f8] sm:$0xff] }
 0x1ea   : > { %1822 = vmatpush.msra.mxu2 %v920_v20  ;;  %1845 = vmatpush.msra.mxu3 %v1024_v21  ;;  %v864_v1 = vld [vmem:[%s2914_s24 + $0x1b0] sm:$0xff] }
 0x1eb   : > { %1881 = vmatpush.msrb.mxu1 %v1312_v23  ;;  %1794 = vmatpush.msra.mxu0 %v1079_v24  ;;  %v1458_v34 = vadd.f32 %v1457_v31, %v1438_v28  ;;  %v1477_v37 = vpop.f32.mrf.mxu0  ;;  %v968_v2 = vld [vmem:[%s2914_s24 + $0x4f0] sm:$0xff] }
 0x1ec   : > { %1823 = vmatpush.msra.mxu2 %v912_v26  ;;  %1846 = vmatpush.msra.mxu3 %v1016_v27  ;;  %v1152_v3 = vld [vmem:[%s2914_s24 + $0xab0] sm:$0xff] }
 0x1ed   : > { %1882 = vmatpush.msrb.mxu1 %v1304_v29  ;;  %1795 = vmatpush.msra.mxu0 %v1071_v30  ;;  %v1478_v40 = vadd.f32 %v1477_v37, %v1458_v34  ;;  %v1256_v4 = vld [vmem:[%s2914_s24 + $0xdf0] sm:$0xff]  ;;  %v1326_v30 = vperm.slane %v3318_v46, 2 }
 0x1ee   : > { %1796 = vmatmul.f32.vlgmr.msra.gmra.mxu0 %v3074_v63  ;;  %1824 = vmatpush.msra.mxu2 %v904_v32  ;;  %v856_v5 = vld [vmem:[%s2914_s24 + $0x170] sm:$0xff]  ;;  %v1057_v32 = vld [vmem:[%s2914_s24 + $0x7b8] sm:$0xff] }
 0x1ef   : > { %v2450_v45 = vpop.eup %2449  ;;  %1847 = vmatpush.msra.mxu3 %v1008_v35  ;;  %1860 = vmatpush.msrb.mxu0 %v1192_v36  ;;  %v1498_v49 = vadd.f32 %v1497_v43, %v1478_v40  ;;  %v960_v7 = vld [vmem:[%s2914_s24 + $0x4b0] sm:$0xff]  ;;  %v1049_v40 = vld [vmem:[%s2914_s24 + $0x778] sm:$0xff] }
 0x1f0   : > { %1883 = vmatpush.msrb.mxu1 %v1296_v38  ;;  %v3368_v51 = vadd.f32 1.0, %v2450_v45  ;;  %1825 = vmatpush.msra.mxu2 %v896_v39  ;;  %v1144_v8 = vld [vmem:[%s2914_s24 + $0xa70] sm:$0xff] }
 0x1f1   : > { %1848 = vmatpush.msra.mxu3 %v1000_v41  ;;  %1861 = vmatpush.msrb.mxu0 %v1184_v42  ;;  %v2331_v56 = vmul.f32 -1.442695, %v1498_v49  ;;  %v1248_v11 = vld [vmem:[%s2914_s24 + $0xdb0] sm:$0xff]  ;;  %v1041_v49 = vld [vmem:[%s2914_s24 + $0x738] sm:$0xff] }
 0x1f2   : > { %2451 = vrcp.f32 %v3368_v51  ;;  %1884 = vmatpush.msrb.mxu1 %v1288_v47  ;;  %1826 = vmatpush.msra.mxu2 %v888_v48  ;;  %v848_v12 = vld [vmem:[%s2914_s24 + $0x130] sm:$0xff]  ;;  %v2023_v19 = vand.u32 2147483648, %v3368_v51  ;;  %v2021_v23 = vand.u32 2147483647, %v3368_v51  ;;  %vm2017_vm2 = vweird.f32 %v3368_v51 }
 0x1f3   : > { %1849 = vmatpush.msra.mxu3 %v992_v52  ;;  %1862 = vmatpush.msrb.mxu0 %v1176_v53  ;;  %2453 = vpow2.f32 %v2331_v56  ;;  %v952_v14 = vld [vmem:[%s2914_s24 + $0x470] sm:$0xff]  ;;  %v937_v53 = vld [vmem:[%s2914_s24 + $0x3f8] sm:$0xff] }
 0x1f4   : > { %1885 = vmatpush.msrb.mxu1 %v1280_v54  ;;  %1827 = vmatpush.msra.mxu2 %v880_v55  ;;  %v1136_v15 = vld [vmem:[%s2914_s24 + $0xa30] sm:$0xff]  ;;  %v2024_v31 = vor.u32 1.1754944e-38, %v2023_v19  ;;  %vm2022_vm4 = vcmp.eq.f32.partialorder %v2021_v23, 8.507059e+37  ;;  %v1009_v19 = vld [vmem:[%s2914_s24 + $0x638] sm:$0xff] }
 0x1f5   : > { %1850 = vmatpush.msra.mxu3 %v984_v57  ;;  %1863 = vmatpush.msrb.mxu0 %v1168_v58  ;;  %v1240_v17 = vld [vmem:[%s2914_s24 + $0xd70] sm:$0xff]  ;;  %v1033_v58 = vld [vmem:[%s2914_s24 + $0x6f8] sm:$0xff] }
 0x1f6   : > { %1886 = vmatpush.msrb.mxu1 %v1272_v59  ;;  %1828 = vmatpush.msra.mxu2 %v872_v60  ;;  %v840_v18 = vld [vmem:[%s2914_s24 + $0xf0] sm:$0xff]  ;;  %v1001_v23 = vld [vmem:[%s2914_s24 + $0x5f8] sm:$0xff] }
 0x1f7   : > { %1851 = vmatpush.msra.mxu3 %v976_v61  ;;  %1864 = vmatpush.msrb.mxu0 %v1160_v62  ;;  %v944_v20 = vld [vmem:[%s2914_s24 + $0x430] sm:$0xff]  ;;  %v929_v62 = vld [vmem:[%s2914_s24 + $0x3b8] sm:$0xff] }
 0x1f8   : > { %v2452_v6 = vpop.eup %2451  ;;  %1887 = vmatpush.msrb.mxu1 %v1264_v0  ;;  %1829 = vmatpush.msra.mxu2 %v864_v1  ;;  %v1128_v21 = vld [vmem:[%s2914_s24 + $0x9f0] sm:$0xff]  ;;  %v1321_v1 = vld [vmem:[%s2914_s24 + $0xff8] sm:$0xff] }
 0x1f9   : > { %v2454_v9 = vpop.eup %2453  ;;  %v2013_v10 = vmul.f32 %v2452_v6, %v3368_v51  ;;  %1852 = vmatpush.msra.mxu3 %v968_v2  ;;  %1865 = vmatpush.msrb.mxu0 %v1152_v3  ;;  %vm2018_vm1 = vweird.f32 %v2452_v6  ;;  %v1232_v24 = vld [vmem:[%s2914_s24 + $0xd30] sm:$0xff] }
 0x1fa   : > { %v3405_v13 = vadd.f32 1.0, %v2454_v9  ;;  %1888 = vmatpush.msrb.mxu1 %v1256_v4  ;;  %1830 = vmatpush.msra.mxu2 %v856_v5  ;;  %v832_v26 = vld [vmem:[%s2914_s24 + $0xb0] sm:$0xff]  ;;  %vm2019_vm3 = vmor %vm2017_vm2, %vm2018_vm1  ;;  %v921_v5 = vld [vmem:[%s2914_s24 + $0x378] sm:$0xff] }
 0x1fb   : > { %v2014_v16 = vsub.f32 1.0, %v2013_v10  ;;  %1853 = vmatpush.msra.mxu3 %v960_v7  ;;  %1866 = vmatpush.msrb.mxu0 %v1144_v8  ;;  %v1120_v28 = vld [vmem:[%s2914_s24 + $0x9b0] sm:$0xff]  ;;  %v1537_v51 = vpop.f32.mrf.mxu3  ;;  %v1313_v9 = vld [vmem:[%s2914_s24 + $0xfb8] sm:$0xff] }
 0x1fc   : > { %2455 = vrcp.f32 %v3405_v13  ;;  %1889 = vmatpush.msrb.mxu1 %v1248_v11  ;;  %1831 = vmatpush.msra.mxu2 %v848_v12  ;;  %v1224_v29 = vld [vmem:[%s2914_s24 + $0xcf0] sm:$0xff]  ;;  %v2038_v56 = vand.u32 2147483648, %v3405_v13  ;;  %v2036_v61 = vand.u32 2147483647, %v3405_v13  ;;  %vm2032_vm6 = vweird.f32 %v3405_v13  ;;  %v913_v12 = vld [vmem:[%s2914_s24 + $0x338] sm:$0xff] }
 0x1fd   : > { %v2015_v22 = vmul.f32 %v2452_v6, %v2014_v16  ;;  %1854 = vmatpush.msra.mxu3 %v952_v14  ;;  %1867 = vmatpush.msrb.mxu0 %v1136_v15  ;;  %v824_v34 = vld [vmem:[%s2914_s24 + $0x70] sm:$0xff]  ;;  %v1305_v16 = vld [vmem:[%s2914_s24 + $0xf78] sm:$0xff] }
 0x1fe   : > { %1890 = vmatpush.msrb.mxu1 %v1240_v17  ;;  %1832 = vmatpush.msra.mxu2 %v840_v18  ;;  %v1112_v36 = vld [vmem:[%s2914_s24 + $0x970] sm:$0xff]  ;;  %v2039_v8 = vor.u32 1.1754944e-38, %v2038_v56  ;;  %vm2037_vm8 = vcmp.eq.f32.partialorder %v2036_v61, 8.507059e+37  ;;  %v905_v18 = vld [vmem:[%s2914_s24 + $0x2f8] sm:$0xff] }
 0x1ff   : > { %v2016_v27 = vadd.f32 %v2452_v6, %v2015_v22  ;;  %1855 = vmatpush.msra.mxu3 %v944_v20  ;;  %1868 = vmatpush.msrb.mxu0 %v1128_v21  ;;  %v1216_v37 = vld [vmem:[%s2914_s24 + $0xcb0] sm:$0xff]  ;;  %v1577_v2 = vpop.f32.mrf.mxu1  ;;  %v1193_v20 = vld [vmem:[%s2914_s24 + $0xbf8] sm:$0xff] }
 0x200   : > { %1891 = vmatpush.msrb.mxu1 %v1232_v24  ;;  %1856 = vmatmul.f32.vlgmr.msra.gmra.mxu3 %v3051_v33  ;;  %v816_v41 = vld [vmem:[%s2914_s24 + $0x30] sm:$0xff]  ;;  %v1297_v21 = vld [vmem:[%s2914_s24 + $0xf38] sm:$0xff] }
 0x201   : > { %v2020_v35 = vsel %vm2019_vm3, %v2452_v6, %v2016_v27  ;;  %1920 = vmatpush.msrb.mxu3 %v1065_v25  ;;  %1833 = vmatpush.msra.mxu2 %v832_v26  ;;  %v1104_v45 = vld [vmem:[%s2914_s24 + $0x930] sm:$0xff]  ;;  %v1025_v6 = vld [vmem:[%s2914_s24 + $0x6b8] sm:$0xff] }
 0x202   : > { %v3435_v38 = vpop.eup %2455  ;;  %v2025_v39 = vsel %vm2022_vm4, %v2024_v31, %v2020_v35  ;;  %1869 = vmatpush.msrb.mxu0 %v1120_v28  ;;  %1892 = vmatpush.msrb.mxu1 %v1224_v29  ;;  %v1517_v42 = vpop.f32.mrf.mxu2  ;;  %v1208_v47 = vld [vmem:[%s2914_s24 + $0xc70] sm:$0xff]  ;;  %v897_v22 = vld [vmem:[%s2914_s24 + $0x2b8] sm:$0xff] }
 0x203   : > { %2132 = vst [vmem:[%s3427_s12] sm:$0xff] %v2025_v39  ;;  %v2028_v43 = vmul.f32 %v3435_v38, %v3405_v13  ;;  %1921 = vmatpush.msrb.mxu3 %v1057_v32  ;;  %1834 = vmatpush.msra.mxu2 %v824_v34  ;;  %v1518_v48 = vadd.f32 %v1517_v42, %v1326_v30  ;;  %v1096_v54 = vld [vmem:[%s2914_s24 + $0x8f0] sm:$0xff]  ;;  %vm2033_vm5 = vweird.f32 %v3435_v38  ;;  %v1017_v13 = vld [vmem:[%s2914_s24 + $0x678] sm:$0xff] }
 0x204   : > { %1870 = vmatpush.msrb.mxu0 %v1112_v36  ;;  %1893 = vmatpush.msrb.mxu1 %v1216_v37  ;;  %v1200_v57 = vld [vmem:[%s2914_s24 + $0xc30] sm:$0xff]  ;;  %vm2034_vm7 = vmor %vm2032_vm6, %vm2033_vm5  ;;  %v1185_v24 = vld [vmem:[%s2914_s24 + $0xbb8] sm:$0xff] }
 0x205   : > { %v2029_v52 = vsub.f32 1.0, %v2028_v43  ;;  %1922 = vmatpush.msrb.mxu3 %v1049_v40  ;;  %1835 = vmatpush.msra.mxu2 %v816_v41  ;;  %v1538_v55 = vadd.f32 %v1537_v51, %v1518_v48  ;;  %v1557_v59 = vpop.f32.mrf.mxu0  ;;  %v1088_v3 = vld [vmem:[%s2914_s24 + $0x8b0] sm:$0xff]  ;;  %v1289_v25 = vld [vmem:[%s2914_s24 + $0xef8] sm:$0xff] }
 0x206   : > { %1871 = vmatpush.msrb.mxu0 %v1104_v45  ;;  %1894 = vmatpush.msrb.mxu1 %v1208_v47  ;;  %v1080_v10 = vld [vmem:[%s2914_s24 + $0x870] sm:$0xff]  ;;  %v889_v26 = vld [vmem:[%s2914_s24 + $0x278] sm:$0xff] }
 0x207   : > { %v2030_v60 = vmul.f32 %v3435_v38, %v2029_v52  ;;  %1836 = vmatmul.f32.vlgmr.msra.gmra.mxu2 %v3057_v44  ;;  %1923 = vmatpush.msrb.mxu3 %v1041_v49  ;;  %v1558_v0 = vadd.f32 %v1557_v59, %v1538_v55  ;;  %v1072_v17 = vld [vmem:[%s2914_s24 + $0x830] sm:$0xff]  ;;  %v993_v27 = vld [vmem:[%s2914_s24 + $0x5b8] sm:$0xff] }
 0x208   : > { %1900 = vmatpush.msrb.mxu2 %v937_v53  ;;  %1872 = vmatpush.msrb.mxu0 %v1096_v54  ;;  %v1177_v28 = vld [vmem:[%s2914_s24 + $0xb78] sm:$0xff] }
 0x209   : > { %v2031_v4 = vadd.f32 %v3435_v38, %v2030_v60  ;;  %1895 = vmatpush.msrb.mxu1 %v1200_v57  ;;  %1924 = vmatpush.msrb.mxu3 %v1033_v58  ;;  %v1578_v7 = vadd.f32 %v1577_v2, %v1558_v0  ;;  %v1281_v30 = vld [vmem:[%s2914_s24 + $0xeb8] sm:$0xff] }
 0x20a   : > { %1896 = vmatmul.f32.vlgmr.msrb.gmra.mxu1 %v3062_v50  ;;  %1901 = vmatpush.msrb.mxu2 %v929_v62  ;;  %v881_v31 = vld [vmem:[%s2914_s24 + $0x238] sm:$0xff] }
 0x20b   : > { %v2035_v11 = vsel %vm2034_vm7, %v3435_v38, %v2031_v4  ;;  %1960 = vmatpush.msra.mxu1 %v1321_v1  ;;  %1873 = vmatpush.msrb.mxu0 %v1088_v3  ;;  %v2332_v14 = vmul.f32 -1.442695, %v1578_v7  ;;  %v985_v34 = vld [vmem:[%s2914_s24 + $0x578] sm:$0xff] }
 0x20c   : > { %v2040_v15 = vsel %vm2037_vm8, %v2039_v8, %v2035_v11  ;;  %1902 = vmatpush.msrb.mxu2 %v921_v5  ;;  %1925 = vmatpush.msrb.mxu3 %v1025_v6  ;;  %v1169_v35 = vld [vmem:[%s2914_s24 + $0xb38] sm:$0xff]  ;;  %v1327_v6 = vperm.slane %v3318_v46, 3 }
 0x20d   : > { %2133 = vst [vmem:[%s3427_s12 + $0x8] sm:$0xff] %v2040_v15  ;;  %1961 = vmatpush.msra.mxu1 %v1313_v9  ;;  %1874 = vmatpush.msrb.mxu0 %v1080_v10  ;;  %2457 = vpow2.f32 %v2332_v14  ;;  %v1273_v36 = vld [vmem:[%s2914_s24 + $0xe78] sm:$0xff] }
 0x20e   : > { %1903 = vmatpush.msrb.mxu2 %v913_v12  ;;  %1926 = vmatpush.msrb.mxu3 %v1017_v13  ;;  %v873_v37 = vld [vmem:[%s2914_s24 + $0x1f8] sm:$0xff] }
 0x20f   : > { %1962 = vmatpush.msra.mxu1 %v1305_v16  ;;  %1875 = vmatpush.msrb.mxu0 %v1072_v17  ;;  %v977_v38 = vld [vmem:[%s2914_s24 + $0x538] sm:$0xff] }
 0x210   : > { %1876 = vmatmul.f32.vlgmr.msrb.gmra.mxu0 %v3074_v63  ;;  %1904 = vmatpush.msrb.mxu2 %v905_v18  ;;  %v1161_v39 = vld [vmem:[%s2914_s24 + $0xaf8] sm:$0xff] }
 0x211   : > { %1927 = vmatpush.msrb.mxu3 %v1009_v19  ;;  %1940 = vmatpush.msra.mxu0 %v1193_v20  ;;  %v1265_v40 = vld [vmem:[%s2914_s24 + $0xe38] sm:$0xff] }
 0x212   : > { %1963 = vmatpush.msra.mxu1 %v1297_v21  ;;  %1905 = vmatpush.msrb.mxu2 %v897_v22  ;;  %v865_v41 = vld [vmem:[%s2914_s24 + $0x1b8] sm:$0xff] }
 0x213   : > { %v2458_v29 = vpop.eup %2457  ;;  %1928 = vmatpush.msrb.mxu3 %v1001_v23  ;;  %1941 = vmatpush.msra.mxu0 %v1185_v24  ;;  %v969_v42 = vld [vmem:[%s2914_s24 + $0x4f8] sm:$0xff] }
 0x214   : > { %v3486_v32 = vadd.f32 1.0, %v2458_v29  ;;  %1964 = vmatpush.msra.mxu1 %v1289_v25  ;;  %1906 = vmatpush.msrb.mxu2 %v889_v26  ;;  %v1153_v43 = vld [vmem:[%s2914_s24 + $0xab8] sm:$0xff] }
 0x215   : > { %1929 = vmatpush.msrb.mxu3 %v993_v27  ;;  %1942 = vmatpush.msra.mxu0 %v1177_v28  ;;  %v1257_v45 = vld [vmem:[%s2914_s24 + $0xdf8] sm:$0xff] }
 0x216   : > { %2459 = vrcp.f32 %v3486_v32  ;;  %1965 = vmatpush.msra.mxu1 %v1281_v30  ;;  %1907 = vmatpush.msrb.mxu2 %v881_v31  ;;  %v857_v47 = vld [vmem:[%s2914_s24 + $0x178] sm:$0xff]  ;;  %v2053_v0 = vand.u32 2147483648, %v3486_v32  ;;  %v2051_v4 = vand.u32 2147483647, %v3486_v32  ;;  %vm2047_vm10 = vweird.f32 %v3486_v32 }
 0x217   : > { %1930 = vmatpush.msrb.mxu3 %v985_v34  ;;  %1943 = vmatpush.msra.mxu0 %v1169_v35  ;;  %v961_v48 = vld [vmem:[%s2914_s24 + $0x4b8] sm:$0xff] }
 0x218   : > { %1966 = vmatpush.msra.mxu1 %v1273_v36  ;;  %1908 = vmatpush.msrb.mxu2 %v873_v37  ;;  %v1145_v49 = vld [vmem:[%s2914_s24 + $0xa78] sm:$0xff]  ;;  %v2054_v11 = vor.u32 1.1754944e-38, %v2053_v0  ;;  %vm2052_vm12 = vcmp.eq.f32.partialorder %v2051_v4, 8.507059e+37  ;;  %v1328_v37 = vperm.slane %v3318_v46, 4 }
 0x219   : > { %1931 = vmatpush.msrb.mxu3 %v977_v38  ;;  %1944 = vmatpush.msra.mxu0 %v1161_v39  ;;  %v1249_v51 = vld [vmem:[%s2914_s24 + $0xdb8] sm:$0xff] }
 0x21a   : > { %1967 = vmatpush.msra.mxu1 %v1265_v40  ;;  %1909 = vmatpush.msrb.mxu2 %v865_v41  ;;  %v849_v52 = vld [vmem:[%s2914_s24 + $0x138] sm:$0xff] }
 0x21b   : > { %1932 = vmatpush.msrb.mxu3 %v969_v42  ;;  %1945 = vmatpush.msra.mxu0 %v1153_v43  ;;  %v953_v54 = vld [vmem:[%s2914_s24 + $0x478] sm:$0xff] }
 0x21c   : > { %v2460_v53 = vpop.eup %2459  ;;  %1968 = vmatpush.msra.mxu1 %v1257_v45  ;;  %1910 = vmatpush.msrb.mxu2 %v857_v47  ;;  %v1137_v55 = vld [vmem:[%s2914_s24 + $0xa38] sm:$0xff] }
 0x21d   : > { %v2043_v56 = vmul.f32 %v2460_v53, %v3486_v32  ;;  %1933 = vmatpush.msrb.mxu3 %v961_v48  ;;  %1946 = vmatpush.msra.mxu0 %v1145_v49  ;;  %v1241_v57 = vld [vmem:[%s2914_s24 + $0xd78] sm:$0xff]  ;;  %vm2048_vm9 = vweird.f32 %v2460_v53  ;;  %v1617_v18 = vpop.f32.mrf.mxu3 }
 0x21e   : > { %v841_v58 = vld [vmem:[%s2914_s24 + $0xf8] sm:$0xff]  ;;  %1969 = vmatpush.msra.mxu1 %v1249_v51  ;;  %1911 = vmatpush.msrb.mxu2 %v849_v52  ;;  %vm2049_vm11 = vmor %vm2047_vm10, %vm2048_vm9 }
 0x21f   : > { %v945_v59 = vld [vmem:[%s2914_s24 + $0x438] sm:$0xff]  ;;  %v2044_v61 = vsub.f32 1.0, %v2043_v56  ;;  %1934 = vmatpush.msrb.mxu3 %v953_v54  ;;  %1947 = vmatpush.msra.mxu0 %v1137_v55 }
 0x220   : > { %v1129_v60 = vld [vmem:[%s2914_s24 + $0x9f8] sm:$0xff]  ;;  %1970 = vmatpush.msra.mxu1 %v1241_v57  ;;  %1912 = vmatpush.msrb.mxu2 %v841_v58 }
 0x221   : > { %v1233_v62 = vld [vmem:[%s2914_s24 + $0xd38] sm:$0xff]  ;;  %v2045_v3 = vmul.f32 %v2460_v53, %v2044_v61  ;;  %1935 = vmatpush.msrb.mxu3 %v945_v59  ;;  %1948 = vmatpush.msra.mxu0 %v1129_v60  ;;  %v1657_v25 = vpop.f32.mrf.mxu1  ;;  %v1329_v61 = vperm.slane %v3318_v46, 5 }
 0x222   : > { %v833_v1 = vld [vmem:[%s2914_s24 + $0xb8] sm:$0xff]  ;;  %1971 = vmatpush.msra.mxu1 %v1233_v62  ;;  %1936 = vmatmul.f32.vlgmr.msrb.gmra.mxu3 %v3051_v33 }
 0x223   : > { %v1121_v2 = vld [vmem:[%s2914_s24 + $0x9b8] sm:$0xff]  ;;  %v2046_v9 = vadd.f32 %v2460_v53, %v2045_v3  ;;  %1913 = vmatpush.msrb.mxu2 %v833_v1 }
 0x224   : > { %v1225_v5 = vld [vmem:[%s2914_s24 + $0xcf8] sm:$0xff]  ;;  %1949 = vmatpush.msra.mxu0 %v1121_v2  ;;  %v1597_v14 = vpop.f32.mrf.mxu2 }
 0x225   : > { %v825_v7 = vld [vmem:[%s2914_s24 + $0x78] sm:$0xff]  ;;  %1972 = vmatpush.msra.mxu1 %v1225_v5  ;;  %v2050_v33 = vsel %vm2049_vm11, %v2460_v53, %v2046_v9  ;;  %v1598_v16 = vadd.f32 %v1597_v14, %v1327_v6 }
 0x226   : > { %v1113_v8 = vld [vmem:[%s2914_s24 + $0x978] sm:$0xff]  ;;  %1914 = vmatpush.msrb.mxu2 %v825_v7  ;;  %v2055_v17 = vsel %vm2052_vm12, %v2054_v11, %v2050_v33 }
 0x227   : > { %v1217_v10 = vld [vmem:[%s2914_s24 + $0xcb8] sm:$0xff]  ;;  %1950 = vmatpush.msra.mxu0 %v1113_v8  ;;  %2134 = vst [vmem:[%s3427_s12 + $0x10] sm:$0xff] %v2055_v17  ;;  %v1618_v21 = vadd.f32 %v1617_v18, %v1598_v16  ;;  %v1637_v23 = vpop.f32.mrf.mxu0 }
 0x228   : > { %v817_v12 = vld [vmem:[%s2914_s24 + $0x38] sm:$0xff]  ;;  %1973 = vmatpush.msra.mxu1 %v1217_v10 }
 0x229   : > { %v1105_v13 = vld [vmem:[%s2914_s24 + $0x938] sm:$0xff]  ;;  %1915 = vmatpush.msrb.mxu2 %v817_v12  ;;  %v1638_v24 = vadd.f32 %v1637_v23, %v1618_v21 }
 0x22a   : > { %v1209_v15 = vld [vmem:[%s2914_s24 + $0xc78] sm:$0xff]  ;;  %1951 = vmatpush.msra.mxu0 %v1105_v13  ;;  %1916 = vmatmul.f32.vlgmr.msrb.gmra.mxu2 %v3057_v44 }
 0x22b   : > { %v1097_v19 = vld [vmem:[%s2914_s24 + $0x8f8] sm:$0xff]  ;;  %1974 = vmatpush.msra.mxu1 %v1209_v15  ;;  %v1658_v27 = vadd.f32 %v1657_v25, %v1638_v24 }
 0x22c   : > { %v1201_v20 = vld [vmem:[%s2914_s24 + $0xc38] sm:$0xff]  ;;  %1952 = vmatpush.msra.mxu0 %v1097_v19  ;;  %v1330_v19 = vperm.slane %v3318_v46, 6 }
 0x22d   : > { %v1089_v22 = vld [vmem:[%s2914_s24 + $0x8b8] sm:$0xff]  ;;  %1975 = vmatpush.msra.mxu1 %v1201_v20  ;;  %v2333_v29 = vmul.f32 -1.442695, %v1658_v27 }
 0x22e   : > { %v1081_v26 = vld [vmem:[%s2914_s24 + $0x878] sm:$0xff]  ;;  %1976 = vmatmul.f32.vlgmr.msra.gmra.mxu1 %v3062_v50  ;;  %1953 = vmatpush.msra.mxu0 %v1089_v22 }
 0x22f   : > { %v1073_v28 = vld [vmem:[%s2914_s24 + $0x838] sm:$0xff]  ;;  %2461 = vpow2.f32 %v2333_v29 }
 0x230   : > { %1954 = vmatpush.msra.mxu0 %v1081_v26 }
 0x232   : > { %1955 = vmatpush.msra.mxu0 %v1073_v28 }
 0x233   : > { %1956 = vmatmul.f32.vlgmr.msra.gmra.mxu0 %v3074_v63 }
 0x235   : > { %v2462_v30 = vpop.eup %2461 }
 0x236   : > { %v2007_v44 = vadd.f32 1.0, %v2462_v30 }
 0x238   : > { %2463 = vrcp.f32 %v2007_v44  ;;  %v2068_v35 = vand.u32 2147483648, %v2007_v44  ;;  %v2066_v50 = vand.u32 2147483647, %v2007_v44  ;;  %vm2062_vm14 = vweird.f32 %v2007_v44 }
 0x23a   : > { %v2069_v39 = vor.u32 1.1754944e-38, %v2068_v35  ;;  %vm2067_vm0 = vcmp.eq.f32.partialorder %v2066_v50, 8.507059e+37 }
 0x23e   : > { %v2464_v31 = vpop.eup %2463 }
 0x23f   : > { %v2058_v32 = vmul.f32 %v2464_v31, %v2007_v44  ;;  %vm2063_vm13 = vweird.f32 %v2464_v31  ;;  %v1697_v43 = vpop.f32.mrf.mxu3 }
 0x240   : > { %vm2064_vm15 = vmor %vm2062_vm14, %vm2063_vm13 }
 0x241   : > { %v2059_v34 = vsub.f32 1.0, %v2058_v32 }
 0x243   : > { %v2060_v36 = vmul.f32 %v2464_v31, %v2059_v34  ;;  %v1737_v49 = vpop.f32.mrf.mxu1 }
 0x245   : > { %v2061_v38 = vadd.f32 %v2464_v31, %v2060_v36 }
 0x246   : > { %v1677_v40 = vpop.f32.mrf.mxu2 }
 0x247   : > { %v2065_v41 = vsel %vm2064_vm15, %v2464_v31, %v2061_v38  ;;  %v1678_v63 = vadd.f32 %v1677_v40, %v1328_v37  ;;  %v1331_v38 = vperm.slane %v3318_v46, 7 }
 0x248   : > { %v2070_v42 = vsel %vm2067_vm0, %v2069_v39, %v2065_v41 }
 0x249   : > { %2135 = vst [vmem:[%s3427_s12 + $0x18] sm:$0xff] %v2070_v42  ;;  %v1698_v45 = vadd.f32 %v1697_v43, %v1678_v63  ;;  %v1717_v47 = vpop.f32.mrf.mxu0 }
 0x24b   : > { %v1718_v48 = vadd.f32 %v1717_v47, %v1698_v45 }
 0x24d   : > { %v1738_v51 = vadd.f32 %v1737_v49, %v1718_v48 }
 0x24f   : > { %v2334_v52 = vmul.f32 -1.442695, %v1738_v51 }
 0x251   : > { %2465 = vpow2.f32 %v2334_v52 }
 0x257   : > { %v2466_v53 = vpop.eup %2465 }
 0x258   : > { %v2008_v54 = vadd.f32 1.0, %v2466_v53 }
 0x25a   : > { %2467 = vrcp.f32 %v2008_v54  ;;  %v2083_v58 = vand.u32 2147483648, %v2008_v54  ;;  %v2081_v60 = vand.u32 2147483647, %v2008_v54  ;;  %vm2077_vm2 = vweird.f32 %v2008_v54 }
 0x25c   : > { %v2084_v0 = vor.u32 1.1754944e-38, %v2083_v58  ;;  %vm2082_vm4 = vcmp.eq.f32.partialorder %v2081_v60, 8.507059e+37 }
 0x260   : > { %v2468_v55 = vpop.eup %2467 }
 0x261   : > { %v2073_v56 = vmul.f32 %v2468_v55, %v2008_v54  ;;  %vm2078_vm1 = vweird.f32 %v2468_v55  ;;  %v1777_v5 = vpop.f32.mrf.mxu3 }
 0x262   : > { %vm2079_vm3 = vmor %vm2077_vm2, %vm2078_vm1 }
 0x263   : > { %v2074_v57 = vsub.f32 1.0, %v2073_v56 }
 0x265   : > { %v2075_v59 = vmul.f32 %v2468_v55, %v2074_v57  ;;  %v1817_v9 = vpop.f32.mrf.mxu1 }
 0x267   : > { %v2076_v62 = vadd.f32 %v2468_v55, %v2075_v59 }
 0x268   : > { %v1757_v1 = vpop.f32.mrf.mxu2 }
 0x269   : > { %v2080_v2 = vsel %vm2079_vm3, %v2468_v55, %v2076_v62  ;;  %v1758_v3 = vadd.f32 %v1757_v1, %v1329_v61 }
 0x26a   : > { %v2085_v4 = vsel %vm2082_vm4, %v2084_v0, %v2080_v2 }
 0x26b   : > { %2136 = vst [vmem:[%s3427_s12 + $0x20] sm:$0xff] %v2085_v4  ;;  %v1778_v6 = vadd.f32 %v1777_v5, %v1758_v3  ;;  %v1797_v7 = vpop.f32.mrf.mxu0 }
 0x26d   : > { %v1798_v8 = vadd.f32 %v1797_v7, %v1778_v6 }
 0x26f   : > { %v1818_v10 = vadd.f32 %v1817_v9, %v1798_v8 }
 0x271   : > { %v2335_v11 = vmul.f32 -1.442695, %v1818_v10 }
 0x273   : > { %2469 = vpow2.f32 %v2335_v11 }
 0x279   : > { %v2470_v12 = vpop.eup %2469 }
 0x27a   : > { %v2009_v13 = vadd.f32 1.0, %v2470_v12 }
 0x27c   : > { %2471 = vrcp.f32 %v2009_v13  ;;  %v2098_v16 = vand.u32 2147483648, %v2009_v13  ;;  %v2096_v18 = vand.u32 2147483647, %v2009_v13  ;;  %vm2092_vm6 = vweird.f32 %v2009_v13 }
 0x27e   : > { %v2099_v21 = vor.u32 1.1754944e-38, %v2098_v16  ;;  %vm2097_vm8 = vcmp.eq.f32.partialorder %v2096_v18, 8.507059e+37 }
 0x282   : > { %v2472_v14 = vpop.eup %2471 }
 0x283   : > { %v2088_v33 = vmul.f32 %v2472_v14, %v2009_v13  ;;  %vm2093_vm5 = vweird.f32 %v2472_v14  ;;  %v1857_v26 = vpop.f32.mrf.mxu3 }
 0x284   : > { %vm2094_vm7 = vmor %vm2092_vm6, %vm2093_vm5 }
 0x285   : > { %v2089_v15 = vsub.f32 1.0, %v2088_v33 }
 0x287   : > { %v2090_v17 = vmul.f32 %v2472_v14, %v2089_v15  ;;  %v1897_v30 = vpop.f32.mrf.mxu1 }
 0x289   : > { %v2091_v20 = vadd.f32 %v2472_v14, %v2090_v17 }
 0x28a   : > { %v1837_v22 = vpop.f32.mrf.mxu2 }
 0x28b   : > { %v2095_v23 = vsel %vm2094_vm7, %v2472_v14, %v2091_v20  ;;  %v1838_v24 = vadd.f32 %v1837_v22, %v1330_v19 }
 0x28c   : > { %v2100_v25 = vsel %vm2097_vm8, %v2099_v21, %v2095_v23 }
 0x28d   : > { %2137 = vst [vmem:[%s3427_s12 + $0x28] sm:$0xff] %v2100_v25  ;;  %v1858_v27 = vadd.f32 %v1857_v26, %v1838_v24  ;;  %v1877_v28 = vpop.f32.mrf.mxu0 }
 0x28f   : > { %v1878_v29 = vadd.f32 %v1877_v28, %v1858_v27 }
 0x291   : > { %v1898_v44 = vadd.f32 %v1897_v30, %v1878_v29 }
 0x293   : > { %v2336_v31 = vmul.f32 -1.442695, %v1898_v44 }
 0x295   : > { %2473 = vpow2.f32 %v2336_v31 }
 0x29b   : > { %v2474_v32 = vpop.eup %2473 }
 0x29c   : > { %v2010_v34 = vadd.f32 1.0, %v2474_v32 }
 0x29e   : > { %2475 = vrcp.f32 %v2010_v34  ;;  %v2113_v37 = vand.u32 2147483648, %v2010_v34  ;;  %v2111_v40 = vand.u32 2147483647, %v2010_v34  ;;  %vm2107_vm10 = vweird.f32 %v2010_v34 }
 0x2a0   : > { %v2114_v42 = vor.u32 1.1754944e-38, %v2113_v37  ;;  %vm2112_vm12 = vcmp.eq.f32.partialorder %v2111_v40, 8.507059e+37 }
 0x2a4   : > { %v2476_v35 = vpop.eup %2475 }
 0x2a5   : > { %v2103_v36 = vmul.f32 %v2476_v35, %v2010_v34  ;;  %vm2108_vm9 = vweird.f32 %v2476_v35  ;;  %v1937_v47 = vpop.f32.mrf.mxu3 }
 0x2a6   : > { %vm2109_vm11 = vmor %vm2107_vm10, %vm2108_vm9 }
 0x2a7   : > { %v2104_v50 = vsub.f32 1.0, %v2103_v36 }
 0x2a9   : > { %v2105_v39 = vmul.f32 %v2476_v35, %v2104_v50 }
 0x2ab   : > { %v2106_v41 = vadd.f32 %v2476_v35, %v2105_v39  ;;  %v1977_v53 = vpop.f32.mrf.mxu1 }
 0x2ad   : > { %v1917_v63 = vpop.f32.mrf.mxu2  ;;  %v2110_v45 = vsel %vm2109_vm11, %v2476_v35, %v2106_v41 }
 0x2ae   : > { %v1918_v43 = vadd.f32 %v1917_v63, %v1331_v38  ;;  %v2115_v48 = vsel %vm2112_vm12, %v2114_v42, %v2110_v45 }
 0x2af   : > { %2138 = vst [vmem:[%s3427_s12 + $0x30] sm:$0xff] %v2115_v48 }
 0x2b0   : > { %v1938_v49 = vadd.f32 %v1937_v47, %v1918_v43  ;;  %v1957_v51 = vpop.f32.mrf.mxu0 }
 0x2b2   : > { %v1958_v52 = vadd.f32 %v1957_v51, %v1938_v49 }
 0x2b4   : > { %v1978_v54 = vadd.f32 %v1977_v53, %v1958_v52 }
 0x2b6   : > { %v2337_v46 = vmul.f32 -1.442695, %v1978_v54 }
 0x2b8   : > { %2477 = vpow2.f32 %v2337_v46 }
 0x2be   : > { %v2478_v55 = vpop.eup %2477 }
 0x2bf   : > { %v2011_v56 = vadd.f32 1.0, %v2478_v55 }
 0x2c1   : > { %2479 = vrcp.f32 %v2011_v56  ;;  %v2128_v60 = vand.u32 2147483648, %v2011_v56  ;;  %v2126_v62 = vand.u32 2147483647, %v2011_v56  ;;  %vm2122_vm14 = vweird.f32 %v2011_v56 }
 0x2c3   : > { %v2129_v1 = vor.u32 1.1754944e-38, %v2128_v60  ;;  %vm2127_vm0 = vcmp.eq.f32.partialorder %v2126_v62, 8.507059e+37 }
 0x2c7   : > { %v2480_v57 = vpop.eup %2479 }
 0x2c8   : > { %v2118_v58 = vmul.f32 %v2480_v57, %v2011_v56  ;;  %vm2123_vm13 = vweird.f32 %v2480_v57 }
 0x2c9   : > { %vm2124_vm15 = vmor %vm2122_vm14, %vm2123_vm13 }
 0x2ca   : > { %v2119_v59 = vsub.f32 1.0, %v2118_v58 }
 0x2cc   : > { %v2120_v61 = vmul.f32 %v2480_v57, %v2119_v59 }
 0x2ce   : > { %v2121_v0 = vadd.f32 %v2480_v57, %v2120_v61 }
 0x2d0   : > { %v2125_v2 = vsel %vm2124_vm15, %v2480_v57, %v2121_v0 }
 0x2d1   : > { %v2130_v3 = vsel %vm2127_vm0, %v2129_v1, %v2125_v2 }
 0x2d2   : > { %2139 = vst [vmem:[%s3427_s12 + $0x38] sm:$0xff] %v2130_v3 }
 0x2d3 PF: > { %s20_s29 = sadd.s32 1, %s2723_s29   ;;  %s3599_s24 = smov %s2707_s25 }
 0x2d4   : > { %p17_p2 = scmp.ge.s32.totalorder %s20_s29, 6   ;;  %s3600_s25 = smov %s2711_s26 }
 0x2d5   : > { %s3601_s26 = smov %s2873_s1  ;;  %s3602_s27 = smov %s2719_s28 }
 0x2d6   : > { %s3603_s28 = smov %s3605_s19  ;;  %19 = sbr.rel (!%p17_p2) target bundleno = 12 (0xc), region = 117 }
 0x2db   :  { %2170 = vsyncpa [#allocation3], 1 }
 0x2dc   :  { %2172 = vsyncpa [#allocation3 + $0x1], 1 }
 0x2dd   :  { %2173 = vsyncpa [#allocation5], 1 }
 0x2de   :  { %2174 = vsyncpa [#allocation8], 1 }

</bundles_post_ra>
